<compile_context>
chip_gen: v5e
topology: v5e:2x2
jax: 0.10.0
libtpu: 0.0.40
codegen_flags: <defaults>
</compile_context>

<pallas_src>
import jax
import jax.numpy as jnp
from jax.experimental import pallas as pl
from jax.experimental.pallas import tpu as pltpu

INPUTDIM = 64       # "inputdim"
HIDDEN = 512        # fixed by the module
EMBEDDIM = 32       # "embeddim"
NORM_EPS_SQ = 1e-12  # clamp on sum-of-squares (kept in f32 normal range; torch clamps the norm at 1e-12)
MAX_TILE_T = 512    # rows per grid step; sized for v7x 64 MiB VMEM (sweep larger on v6e/v5e)


def _round_up(x, m):
    return ((x + m - 1) // m) * m


def _l2_normalize(x):
    # F.normalize(dim=-1)-style; rsqrt goes to the EUP slot (free next to the MXU).
    ss = jnp.sum(x * x, axis=-1, keepdims=True)
    return x * jax.lax.rsqrt(jnp.maximum(ss, NORM_EPS_SQ))


def _mlp(x_bf16, w1_ref, b1_ref, w2_ref, b2_ref, w3_ref, b3_ref, w4_ref, final_bias):
    """Shared (siamese) 4-layer projection. bf16 MXU operands, f32 accumulation.
    Dropout(0.5) layers are identity at inference."""
    h = jnp.dot(x_bf16, w1_ref[...], preferred_element_type=jnp.float32) + b1_ref[...]
    h = jnp.maximum(h, 0.0).astype(jnp.bfloat16)
    h = jnp.dot(h, w2_ref[...], preferred_element_type=jnp.float32) + b2_ref[...]
    h = jnp.maximum(h, 0.0).astype(jnp.bfloat16)
    h = jnp.dot(h, w3_ref[...], preferred_element_type=jnp.float32) + b3_ref[...]
    h = jnp.maximum(h, 0.0).astype(jnp.bfloat16)
    return jnp.dot(h, w4_ref[...], preferred_element_type=jnp.float32) + final_bias


# ---------------------------------------------------------------------------
# Kernels
# ---------------------------------------------------------------------------

def siamese_query_kernel(query_ref, w1_ref, b1_ref, w2_ref, b2_ref,
                         w3_ref, b3_ref, w4_ref, b4_ref, qemb_ref):
    # Query branch: (B, D) -> (B, E). Tiny; runs once, un-gridded, fully VMEM-resident.
    qn = _l2_normalize(query_ref[...]).astype(jnp.bfloat16)
    qemb_ref[...] = _mlp(qn, w1_ref, b1_ref, w2_ref, b2_ref, w3_ref, b3_ref,
                         w4_ref, b4_ref[...])


def siamese_audio_kernel(audio_ref, qemb_ref, w1_ref, b1_ref, w2_ref, b2_ref,
                         w3_ref, b3_ref, w4_ref, b4_ref, dis_ref):
    # One (TILE_T, D) tile of one batch element.
    xn = _l2_normalize(audio_ref[...]).astype(jnp.bfloat16)          # (TILE_T, D)
    # Fold the last-layer bias and the -q_emb subtraction into a single epilogue bias.
    final_bias = b4_ref[...] - qemb_ref[...]                          # (1, E) f32
    diff = _mlp(xn, w1_ref, b1_ref, w2_ref, b2_ref, w3_ref, b3_ref,
                w4_ref, final_bias)                                   # (TILE_T, E) = a_emb - q_emb
    d2 = jnp.sum(diff * diff, axis=-1, keepdims=True)                 # (TILE_T, 1) f32
    dis_ref[...] = jnp.exp(-jnp.sqrt(d2))                             # (TILE_T, 1)


# ---------------------------------------------------------------------------
# Wrapper
# ---------------------------------------------------------------------------

def siamese_forward(audio_feats, query_embeds, params, *, max_tile_t=MAX_TILE_T):
    B, T, D = audio_feats.shape
    H = params["w1"].shape[1]
    E = params["w4"].shape[1]

    w_args = (params["w1"], params["b1"], params["w2"], params["b2"],
              params["w3"], params["b3"], params["w4"], params["b4"])

    # ---- query branch: computed exactly once (not per grid step) -------------
    vmem = pl.BlockSpec(memory_space=pltpu.MemorySpace.VMEM)
    q_emb = pl.pallas_call(
        siamese_query_kernel,
        out_shape=jax.ShapeDtypeStruct((B, E), jnp.float32),
        in_specs=[vmem] * 9,
        out_specs=vmem,
    )(query_embeds, *w_args)

    # ---- audio branch: grid over (batch, time tiles), weights VMEM-resident --
    tile_t = min(max_tile_t, _round_up(T, 8))
    t_pad = _round_up(T, tile_t)
    if t_pad != T:
        # Pad in the wrapper (free XLA metadata / HBM pad); padded rows are discarded below.
        audio_feats = jnp.pad(audio_feats, ((0, 0), (0, t_pad - T), (0, 0)))

    grid = (B, t_pad // tile_t)

    def const_map(b, t):  # weights/biases: same block every step -> DMA'd once
        return (0, 0)

    in_specs = [
        pl.BlockSpec((None, tile_t, D), lambda b, t: (b, t, 0)),   # audio tile (squeezed batch)
        pl.BlockSpec((1, E), lambda b, t: (b, 0)),                 # q_emb row for batch b
        pl.BlockSpec((D, H), const_map), pl.BlockSpec((1, H), const_map),   # w1, b1
        pl.BlockSpec((H, H), const_map), pl.BlockSpec((1, H), const_map),   # w2, b2
        pl.BlockSpec((H, H), const_map), pl.BlockSpec((1, H), const_map),   # w3, b3
        pl.BlockSpec((H, E), const_map), pl.BlockSpec((1, E), const_map),   # w4, b4
    ]
    out_specs = pl.BlockSpec((None, tile_t, 1), lambda b, t: (b, t, 0))

    dis = pl.pallas_call(
        siamese_audio_kernel,
        out_shape=jax.ShapeDtypeStruct((B, t_pad, 1), jnp.float32),
        grid=grid,
        in_specs=in_specs,
        out_specs=out_specs,
        compiler_params=pltpu.CompilerParams(
            dimension_semantics=("parallel", "parallel")),
    )(audio_feats, q_emb, *w_args)

    return dis[:, :T, 0]


# ---------------------------------------------------------------------------
# Params + references
# ---------------------------------------------------------------------------

def init_params(key):
    # PyTorch-Linear-like uniform fan-in init; weights stored bf16 (MXU operands),
    # biases stay f32 (added post-accumulation).
    def linear(k, fan_in, fan_out):
        kw, kb = jax.random.split(k)
        bound = 1.0 / jnp.sqrt(fan_in)
        w = jax.random.uniform(kw, (fan_in, fan_out), jnp.float32, -bound, bound)
        b = jax.random.uniform(kb, (1, fan_out), jnp.float32, -bound, bound)
        return w.astype(jnp.bfloat16), b

    k1, k2, k3, k4 = jax.random.split(key, 4)
    w1, b1 = linear(k1, INPUTDIM, HIDDEN)
    w2, b2 = linear(k2, HIDDEN, HIDDEN)
    w3, b3 = linear(k3, HIDDEN, HIDDEN)
    w4, b4 = linear(k4, HIDDEN, EMBEDDIM)
    return dict(w1=w1, b1=b1, w2=w2, b2=b2, w3=w3, b3=b3, w4=w4, b4=b4)


def siamese_reference_matched(audio, query, p):
    # Pure-JAX reference with the SAME numerics as the kernel (bf16 matmul operands,
    # f32 accumulation, rsqrt-normalize) -> tight tolerance.
    def project(x):
        h = jnp.dot(x.astype(jnp.bfloat16), p["w1"], preferred_element_type=jnp.float32) + p["b1"]
        h = jnp.maximum(h, 0.0).astype(jnp.bfloat16)
        h = jnp.dot(h, p["w2"], preferred_element_type=jnp.float32) + p["b2"]
        h = jnp.maximum(h, 0.0).astype(jnp.bfloat16)
        h = jnp.dot(h, p["w3"], preferred_element_type=jnp.float32) + p["b3"]
        h = jnp.maximum(h, 0.0).astype(jnp.bfloat16)
        return jnp.dot(h, p["w4"], preferred_element_type=jnp.float32) + p["b4"]

    a_e = project(_l2_normalize(audio))
    q_e = project(_l2_normalize(query))
    diff = a_e - q_e[:, None, :]
    return jnp.exp(-jnp.sqrt(jnp.sum(diff * diff, axis=-1)))


def siamese_reference_f32(audio, query, p):
    # Torch-semantics reference in full f32 (looser tolerance: bf16 operand quantization).
    def norm(x):
        n = jnp.sqrt(jnp.sum(x * x, axis=-1, keepdims=True))
        return x / jnp.maximum(n, 1e-12)

    w1, w2 = p["w1"].astype(jnp.float32), p["w2"].astype(jnp.float32)
    w3, w4 = p["w3"].astype(jnp.float32), p["w4"].astype(jnp.float32)

    def project(x):
        h = jnp.maximum(x @ w1 + p["b1"], 0.0)
        h = jnp.maximum(h @ w2 + p["b2"], 0.0)
        h = jnp.maximum(h @ w3 + p["b3"], 0.0)
        return h @ w4 + p["b4"]

    a_e = project(norm(audio))
    q_e = project(norm(query))
    diff = a_e - q_e[:, None, :]
    return jnp.exp(-jnp.sqrt(jnp.sum(diff * diff, axis=-1)))


if __name__ == "__main__":
    key = jax.random.PRNGKey(0)
    k_audio, k_query, k_params, k_audio2 = jax.random.split(key, 4)
    params = init_params(k_params)

    # Small canonical shapes (single tile per batch element).
    B, T = 2, 8
    audio_feats = jax.random.normal(k_audio, (B, T, INPUTDIM), jnp.float32)
    query_embeds = jax.random.normal(k_query, (B, INPUTDIM), jnp.float32)

    dis = jax.block_until_ready(siamese_forward(audio_feats, query_embeds, params))
    assert dis.shape == (B, T)
    assert bool(jnp.all(jnp.isfinite(dis)))
    ref_m = siamese_reference_matched(audio_feats, query_embeds, params)
    ref_f = siamese_reference_f32(audio_feats, query_embeds, params)
    assert jnp.allclose(dis, ref_m, atol=2e-3, rtol=2e-3), (dis, ref_m)
    assert jnp.allclose(dis, ref_f, atol=5e-2, rtol=5e-2), (dis, ref_f)

    # Exercise the tiled/padded multi-grid-step path (T > TILE_T, non-multiple).
    T2 = 520
    audio_feats2 = jax.random.normal(k_audio2, (B, T2, INPUTDIM), jnp.float32)
    dis2 = jax.block_until_ready(siamese_forward(audio_feats2, query_embeds, params))
    assert dis2.shape == (B, T2)
    assert bool(jnp.all(jnp.isfinite(dis2)))
    ref2 = siamese_reference_matched(audio_feats2, query_embeds, params)
    assert jnp.allclose(dis2, ref2, atol=2e-3, rtol=2e-3)

    print("KERNEL_OK")
</pallas_src>

<mosaic_0001>
module attributes {stable_mosaic.version = 11 : i64} {
  func.func @siamese_query_kernel(%arg0: memref<2x64xf32, #tpu.memory_space<vmem>>, %arg1: memref<64x512xbf16, #tpu.memory_space<vmem>>, %arg2: memref<1x512xf32, #tpu.memory_space<vmem>>, %arg3: memref<512x512xbf16, #tpu.memory_space<vmem>>, %arg4: memref<1x512xf32, #tpu.memory_space<vmem>>, %arg5: memref<512x512xbf16, #tpu.memory_space<vmem>>, %arg6: memref<1x512xf32, #tpu.memory_space<vmem>>, %arg7: memref<512x32xbf16, #tpu.memory_space<vmem>>, %arg8: memref<1x32xf32, #tpu.memory_space<vmem>>, %arg9: memref<2x32xf32, #tpu.memory_space<vmem>>) attributes {dimension_semantics = [], scalar_prefetch = 0 : i64, scratch_operands = 0 : i64, tpu.core_type = #tpu.core_type<tc>} {
    %c0 = arith.constant 0 : index
    %c0_0 = arith.constant 0 : index
    %0 = vector.load %arg0[%c0, %c0_0] : memref<2x64xf32, #tpu.memory_space<vmem>>, vector<2x64xf32>
    %1 = arith.mulf %0, %0 : vector<2x64xf32>
    %cst = arith.constant dense<0.000000e+00> : vector<2xf32>
    %2 = vector.multi_reduction <add>, %1, %cst [1] : vector<2x64xf32> to vector<2xf32>
    %3 = vector.shape_cast %2 : vector<2xf32> to vector<2x1xf32>
    %cst_1 = arith.constant 9.99999996E-13 : f32
    %4 = vector.broadcast %cst_1 : f32 to vector<2x1xf32>
    %5 = arith.maximumf %3, %4 : vector<2x1xf32>
    %6 = math.rsqrt %5 : vector<2x1xf32>
    %7 = vector.broadcast %6 : vector<2x1xf32> to vector<2x64xf32>
    %8 = arith.mulf %0, %7 : vector<2x64xf32>
    %9 = arith.truncf %8 : vector<2x64xf32> to vector<2x64xbf16>
    %c0_2 = arith.constant 0 : index
    %c0_3 = arith.constant 0 : index
    %10 = vector.load %arg8[%c0_2, %c0_3] : memref<1x32xf32, #tpu.memory_space<vmem>>, vector<1x32xf32>
    %c0_4 = arith.constant 0 : index
    %c0_5 = arith.constant 0 : index
    %11 = vector.load %arg1[%c0_4, %c0_5] : memref<64x512xbf16, #tpu.memory_space<vmem>>, vector<64x512xbf16>
    %cst_6 = arith.constant dense<0.000000e+00> : vector<2x512xf32>
    %12 = tpu.matmul %9, %11, %cst_6 {dimension_numbers = #tpu.dot_dimension_numbers<[1], [0], [0], [1], [0, 0, 1, 1], [], []>} : vector<2x64xbf16>, vector<64x512xbf16>, vector<2x512xf32> -> vector<2x512xf32>
    %c0_7 = arith.constant 0 : index
    %c0_8 = arith.constant 0 : index
    %13 = vector.load %arg2[%c0_7, %c0_8] : memref<1x512xf32, #tpu.memory_space<vmem>>, vector<1x512xf32>
    %14 = vector.broadcast %13 : vector<1x512xf32> to vector<2x512xf32>
    %15 = arith.addf %12, %14 : vector<2x512xf32>
    %cst_9 = arith.constant 0.000000e+00 : f32
    %16 = vector.broadcast %cst_9 : f32 to vector<2x512xf32>
    %17 = arith.maximumf %15, %16 : vector<2x512xf32>
    %18 = arith.truncf %17 : vector<2x512xf32> to vector<2x512xbf16>
    %c0_10 = arith.constant 0 : index
    %c0_11 = arith.constant 0 : index
    %19 = vector.load %arg3[%c0_10, %c0_11] : memref<512x512xbf16, #tpu.memory_space<vmem>>, vector<512x512xbf16>
    %cst_12 = arith.constant dense<0.000000e+00> : vector<2x512xf32>
    %20 = tpu.matmul %18, %19, %cst_12 {dimension_numbers = #tpu.dot_dimension_numbers<[1], [0], [0], [1], [0, 0, 1, 1], [], []>} : vector<2x512xbf16>, vector<512x512xbf16>, vector<2x512xf32> -> vector<2x512xf32>
    %c0_13 = arith.constant 0 : index
    %c0_14 = arith.constant 0 : index
    %21 = vector.load %arg4[%c0_13, %c0_14] : memref<1x512xf32, #tpu.memory_space<vmem>>, vector<1x512xf32>
    %22 = vector.broadcast %21 : vector<1x512xf32> to vector<2x512xf32>
    %23 = arith.addf %20, %22 : vector<2x512xf32>
    %cst_15 = arith.constant 0.000000e+00 : f32
    %24 = vector.broadcast %cst_15 : f32 to vector<2x512xf32>
    %25 = arith.maximumf %23, %24 : vector<2x512xf32>
    %26 = arith.truncf %25 : vector<2x512xf32> to vector<2x512xbf16>
    %c0_16 = arith.constant 0 : index
    %c0_17 = arith.constant 0 : index
    %27 = vector.load %arg5[%c0_16, %c0_17] : memref<512x512xbf16, #tpu.memory_space<vmem>>, vector<512x512xbf16>
    %cst_18 = arith.constant dense<0.000000e+00> : vector<2x512xf32>
    %28 = tpu.matmul %26, %27, %cst_18 {dimension_numbers = #tpu.dot_dimension_numbers<[1], [0], [0], [1], [0, 0, 1, 1], [], []>} : vector<2x512xbf16>, vector<512x512xbf16>, vector<2x512xf32> -> vector<2x512xf32>
    %c0_19 = arith.constant 0 : index
    %c0_20 = arith.constant 0 : index
    %29 = vector.load %arg6[%c0_19, %c0_20] : memref<1x512xf32, #tpu.memory_space<vmem>>, vector<1x512xf32>
    %30 = vector.broadcast %29 : vector<1x512xf32> to vector<2x512xf32>
    %31 = arith.addf %28, %30 : vector<2x512xf32>
    %cst_21 = arith.constant 0.000000e+00 : f32
    %32 = vector.broadcast %cst_21 : f32 to vector<2x512xf32>
    %33 = arith.maximumf %31, %32 : vector<2x512xf32>
    %34 = arith.truncf %33 : vector<2x512xf32> to vector<2x512xbf16>
    %c0_22 = arith.constant 0 : index
    %c0_23 = arith.constant 0 : index
    %35 = vector.load %arg7[%c0_22, %c0_23] : memref<512x32xbf16, #tpu.memory_space<vmem>>, vector<512x32xbf16>
    %cst_24 = arith.constant dense<0.000000e+00> : vector<2x32xf32>
    %36 = tpu.matmul %34, %35, %cst_24 {dimension_numbers = #tpu.dot_dimension_numbers<[1], [0], [0], [1], [0, 0, 1, 1], [], []>} : vector<2x512xbf16>, vector<512x32xbf16>, vector<2x32xf32> -> vector<2x32xf32>
    %37 = vector.broadcast %10 : vector<1x32xf32> to vector<2x32xf32>
    %38 = arith.addf %36, %37 : vector<2x32xf32>
    %c0_25 = arith.constant 0 : index
    %c0_26 = arith.constant 0 : index
    %39 = vector.load %arg9[%c0_25, %c0_26] : memref<2x32xf32, #tpu.memory_space<vmem>>, vector<2x32xf32>
    tpu.vector_store %arg9[%c0_25, %c0_26], %38 {strides = array<i32>} : memref<2x32xf32, #tpu.memory_space<vmem>>, vector<2x32xf32>,
    return
  }
}

</mosaic_0001>

<bundles_post_ra>
// kernel: tpu_custom_call.1
= control target key start
LH: loop header
LB: loop body
LE: loop exit
PB: predicated region body
PF: predicated region fallthrough
CT: control target
= control target key end

     0   :  { %14 = vsyncpa [#allocation3], 0  ;;  %s4549_s0 = inlined_call_operand.vmem [shape: f32[2,64], index: 0, kind: input, shape index: {}]   ;;  %s4550_s1 = inlined_call_operand.vmem [shape: bf16[64,512], index: 1, kind: input, shape index: {}]   ;;  %s4551_s2 = inlined_call_operand.vmem [shape: f32[1,512], index: 2, kind: input, shape index: {}]   ;;  %s4552_s3 = inlined_call_operand.hbm [shape: bf16[512,512], index: 3, kind: input, shape index: {}]   ;;  %s4553_s4 = inlined_call_operand.vmem [shape: f32[1,512], index: 4, kind: input, shape index: {}]   ;;  %s4554_s5 = inlined_call_operand.hbm [shape: bf16[512,512], index: 5, kind: input, shape index: {}]   ;;  %s4555_s6 = inlined_call_operand.vmem [shape: f32[1,512], index: 6, kind: input, shape index: {}]   ;;  %s4556_s7 = inlined_call_operand.vmem [shape: bf16[512,32], index: 7, kind: input, shape index: {}]   ;;  %s4557_s8 = inlined_call_operand.vmem [shape: f32[1,32], index: 8, kind: input, shape index: {}]   ;;  %s4558_s9 = inlined_call_operand.hbm [shape: f32[2,32], index: 9, kind: output, shape index: {}]  }
   0x1   :  { %15 = vsyncpa [#allocation6], 0 }
   0x2   :  { %16 = vsyncpa [#allocation4], 0  ;;  %s27_s11 = sshll.u32 %s4552_s3, 4  ;;  %s4185_s12 = smov [#allocation2]   ;;  %s28_s11 = int_to_ptr.hbm [resolvable:$true] %s27_s11 }
   0x3   :  { %s29_s13 = sshll.u32 %s4185_s12, 4  ;;  %s42_s16 = sshll.u32 %s4554_s5, 4  ;;  %s30_s13 = int_to_ptr.vmem [resolvable:$true] %s29_s13  ;;  %s43_s16 = int_to_ptr.hbm [resolvable:$true] %s42_s16 }
   0x4   :  { %s4186_s17 = smov 256   ;;  %s4187_s18 = smov 16  }
   0x5   :  { %35 = dma.hbm_to_vmem [thread:$0]  %s28_s11, 16384, %s30_s13, [#allocation3], %s4186_s17, %s4186_s17, %s4187_s18  }
   0x6   :  { %s4188_s19 = smov [#allocation5]  }
   0x7   :  { %s44_s20 = sshll.u32 %s4188_s19, 4  ;;  %s45_s20 = int_to_ptr.vmem [resolvable:$true] %s44_s20 }
   0x8   :  { %50 = dma.hbm_to_vmem [thread:$0]  %s43_s16, 16384, %s45_s20, [#allocation6], %s4186_s17, %s4186_s17, %s4187_s18  }
   0x9   :  { %4179 = dma.done.wait [#allocation3], 16384  }
   0xa   :  { %4180 = vsyncadd [#allocation3], 4294950912 }
   0xb   :  { %4181 = dma.done.wait [#allocation6], 16384  }
   0xc   :  { %4182 = vsyncadd [#allocation6], 4294950912  ;;  %v4249_v0 = vld [vmem:[%s4549_s0] sm:$0x3]  ;;  %vm68_vm0 = vcmask 517120   ;;  %vm192_vm4 = vcmask 523264  }
   0xd   :  { %v67_v1 = vmul.f32 %v4249_v0, %v4249_v0  ;;  %v2625_v3 = vld [vmem:[%s4550_s1 + $0x60] sm:$0xf]  ;;  %v3809_v4 = vld [vmem:[%s4550_s1 + $0x6c] sm:$0xf0]  ;;  %v3807_v5 = vld [vmem:[%s4550_s1 + $0x64] sm:$0xf] }
   0xe   :  { %v2626_v6 = vor.u32 %v3809_v4, %v2625_v3  ;;  %v2627_v7 = vld [vmem:[%s4550_s1 + $0x70] sm:$0xf0]  ;;  %v2633_v8 = vld [vmem:[%s4550_s1 + $0x68] sm:$0xf]  ;;  %v3810_v9 = vld [vmem:[%s4550_s1 + $0x74] sm:$0xf0] }
   0xf   :  { %v69_v2 = vsel %vm68_vm0, %v67_v1, 0.0  ;;  %v2630_v10 = vor.u32 %v3807_v5, %v2627_v7  ;;  %v2634_v11 = vor.u32 %v3810_v9, %v2633_v8  ;;  %v3808_v12 = vld [vmem:[%s4550_s1 + $0x6c] sm:$0xf]  ;;  %v2635_v13 = vld [vmem:[%s4550_s1 + $0x78] sm:$0xf0]  ;;  %s4189_s26 = smov [#allocation7]  }
  0x10   :  { %70 = vadd.xlane.f32.xlu0 %v69_v2  ;;  %200 = vmatpush.bf16.msra.mxu0 %v2626_v6  ;;  %v2638_v14 = vor.u32 %v3808_v12, %v2635_v13  ;;  %v2609_v15 = vld [vmem:[%s4550_s1 + $0x40] sm:$0xf]  ;;  %v3805_v16 = vld [vmem:[%s4550_s1 + $0x4c] sm:$0xf0]  ;;  %v3803_v17 = vld [vmem:[%s4550_s1 + $0x44] sm:$0xf] }
  0x11   :  { %213 = vmatpush.bf16.msra.mxu1 %v2630_v10  ;;  %226 = vmatpush.bf16.msra.mxu2 %v2634_v11  ;;  %v2610_v18 = vor.u32 %v3805_v16, %v2609_v15  ;;  %v2611_v19 = vld [vmem:[%s4550_s1 + $0x50] sm:$0xf0]  ;;  %v2617_v20 = vld [vmem:[%s4550_s1 + $0x48] sm:$0xf]  ;;  %v3806_v21 = vld [vmem:[%s4550_s1 + $0x54] sm:$0xf0] }
  0x12   :  { %239 = vmatpush.bf16.msra.mxu3 %v2638_v14  ;;  %v2614_v22 = vor.u32 %v3803_v17, %v2611_v19  ;;  %v2618_v23 = vor.u32 %v3806_v21, %v2617_v20  ;;  %v3804_v24 = vld [vmem:[%s4550_s1 + $0x4c] sm:$0xf]  ;;  %v2619_v25 = vld [vmem:[%s4550_s1 + $0x58] sm:$0xf0]  ;;  %v2593_v27 = vld [vmem:[%s4550_s1 + $0x20] sm:$0xf] }
  0x13   :  { %v2622_v26 = vor.u32 %v3804_v24, %v2619_v25  ;;  %v3801_v28 = vld [vmem:[%s4550_s1 + $0x2c] sm:$0xf0]  ;;  %v3799_v29 = vld [vmem:[%s4550_s1 + $0x24] sm:$0xf]  ;;  %v2595_v31 = vld [vmem:[%s4550_s1 + $0x30] sm:$0xf0] }
  0x14   :  { %201 = vmatpush.bf16.msra.mxu0 %v2610_v18  ;;  %v2594_v30 = vor.u32 %v3801_v28, %v2593_v27  ;;  %v2601_v32 = vld [vmem:[%s4550_s1 + $0x28] sm:$0xf]  ;;  %v3802_v33 = vld [vmem:[%s4550_s1 + $0x34] sm:$0xf0]  ;;  %v2598_v34 = vor.u32 %v3799_v29, %v2595_v31  ;;  %v3800_v36 = vld [vmem:[%s4550_s1 + $0x2c] sm:$0xf] }
  0x15   :  { %214 = vmatpush.bf16.msra.mxu1 %v2614_v22  ;;  %227 = vmatpush.bf16.msra.mxu2 %v2618_v23  ;;  %v2602_v35 = vor.u32 %v3802_v33, %v2601_v32  ;;  %v2603_v37 = vld [vmem:[%s4550_s1 + $0x38] sm:$0xf0]  ;;  %v2577_v39 = vld [vmem:[%s4550_s1] sm:$0xf]  ;;  %v3797_v40 = vld [vmem:[%s4550_s1 + $0xc] sm:$0xf0] }
  0x16   :  { %240 = vmatpush.bf16.msra.mxu3 %v2622_v26  ;;  %v2606_v38 = vor.u32 %v3800_v36, %v2603_v37  ;;  %v3795_v41 = vld [vmem:[%s4550_s1 + $0x4] sm:$0xf]  ;;  %v2578_v42 = vor.u32 %v3797_v40, %v2577_v39  ;;  %v2579_v43 = vld [vmem:[%s4550_s1 + $0x10] sm:$0xf0]  ;;  %v2585_v44 = vld [vmem:[%s4550_s1 + $0x8] sm:$0xf] }
  0x17   :  { %v3798_v45 = vld [vmem:[%s4550_s1 + $0x14] sm:$0xf0]  ;;  %v2582_v46 = vor.u32 %v3795_v41, %v2579_v43  ;;  %v3796_v48 = vld [vmem:[%s4550_s1 + $0xc] sm:$0xf]  ;;  %v2587_v49 = vld [vmem:[%s4550_s1 + $0x18] sm:$0xf0] }
  0x18   :  { %202 = vmatpush.bf16.msra.mxu0 %v2594_v30  ;;  %v2586_v47 = vor.u32 %v3798_v45, %v2585_v44  ;;  %v2590_v50 = vor.u32 %v3796_v48, %v2587_v49  ;;  %v2757_v51 = vld [vmem:[#allocation2 + $0xe0] sm:$0xf]  ;;  %v3841_v52 = vld [vmem:[#allocation2 + $0xec] sm:$0xf0]  ;;  %s2562_s0 = sshll.u32 %s4189_s26, 4  ;;  %s2564_s29 = sshll.u32 %s4558_s9, 4  ;;  %s2563_s0 = int_to_ptr.vmem [resolvable:$true] %s2562_s0  ;;  %s2565_s29 = int_to_ptr.hbm [resolvable:$true] %s2564_s29 }
  0x19   :  { %215 = vmatpush.bf16.msra.mxu1 %v2598_v34  ;;  %228 = vmatpush.bf16.msra.mxu2 %v2602_v35  ;;  %v2885_v53 = vld [vmem:[#allocation2 + $0x1e0] sm:$0xf]  ;;  %v2758_v54 = vor.u32 %v3841_v52, %v2757_v51  ;;  %v3873_v55 = vld [vmem:[#allocation2 + $0x1ec] sm:$0xf0]  ;;  %vm2555_vm5 = vcmask 254976  }
  0x1a   :  { %241 = vmatpush.bf16.msra.mxu3 %v2606_v38  ;;  %v2741_v56 = vld [vmem:[#allocation2 + $0xc0] sm:$0xf]  ;;  %v3837_v57 = vld [vmem:[#allocation2 + $0xcc] sm:$0xf0]  ;;  %v2886_v58 = vor.u32 %v3873_v55, %v2885_v53 }
  0x1b   :  { %v2869_v59 = vld [vmem:[#allocation2 + $0x1c0] sm:$0xf]  ;;  %v3869_v60 = vld [vmem:[#allocation2 + $0x1cc] sm:$0xf0]  ;;  %v2742_v62 = vor.u32 %v3837_v57, %v2741_v56 }
  0x1c   :  { %203 = vmatpush.bf16.msra.mxu0 %v2578_v42  ;;  %v3013_v61 = vld [vmem:[#allocation2 + $0x2e0] sm:$0xf]  ;;  %v3905_v63 = vld [vmem:[#allocation2 + $0x2ec] sm:$0xf0]  ;;  %v2870_v3 = vor.u32 %v3869_v60, %v2869_v59 }
  0x1d   :  { %216 = vmatpush.bf16.msra.mxu1 %v2582_v46  ;;  %229 = vmatpush.bf16.msra.mxu2 %v2586_v47  ;;  %v3141_v1 = vld [vmem:[#allocation2 + $0x3e0] sm:$0xf]  ;;  %v3937_v2 = vld [vmem:[#allocation2 + $0x3ec] sm:$0xf0]  ;;  %v3014_v4 = vor.u32 %v3905_v63, %v3013_v61 }
  0x1e   :  { %242 = vmatpush.bf16.msra.mxu3 %v2590_v50  ;;  %v3142_v5 = vor.u32 %v3937_v2, %v3141_v1  ;;  %v2725_v6 = vld [vmem:[#allocation2 + $0xa0] sm:$0xf]  ;;  %v3833_v7 = vld [vmem:[#allocation2 + $0xac] sm:$0xf0] }
  0x1f   :  { %v2853_v8 = vld [vmem:[#allocation2 + $0x1a0] sm:$0xf]  ;;  %v3865_v9 = vld [vmem:[#allocation2 + $0x1ac] sm:$0xf0]  ;;  %v2726_v17 = vor.u32 %v3833_v7, %v2725_v6 }
  0x20   :  { %1034 = vmatpush.bf16.msrb.mxu0 %v2758_v54  ;;  %v2997_v10 = vld [vmem:[#allocation2 + $0x2c0] sm:$0xf]  ;;  %v3901_v11 = vld [vmem:[#allocation2 + $0x2cc] sm:$0xf0]  ;;  %v2854_v21 = vor.u32 %v3865_v9, %v2853_v8 }
  0x21   :  { %1047 = vmatpush.bf16.msrb.mxu1 %v2886_v58  ;;  %1060 = vmatpush.bf16.msrb.mxu2 %v3014_v4  ;;  %v2998_v13 = vor.u32 %v3901_v11, %v2997_v10  ;;  %v3125_v14 = vld [vmem:[#allocation2 + $0x3c0] sm:$0xf]  ;;  %v3933_v15 = vld [vmem:[#allocation2 + $0x3cc] sm:$0xf0] }
  0x22   :  { %1073 = vmatpush.bf16.msrb.mxu3 %v3142_v5  ;;  %v3126_v18 = vor.u32 %v3933_v15, %v3125_v14  ;;  %v2709_v19 = vld [vmem:[#allocation2 + $0x80] sm:$0xf]  ;;  %v3829_v20 = vld [vmem:[#allocation2 + $0x8c] sm:$0xf0] }
  0x23   :  { %v2837_v22 = vld [vmem:[#allocation2 + $0x180] sm:$0xf]  ;;  %v3897_v24 = vld [vmem:[#allocation2 + $0x2ac] sm:$0xf0]  ;;  %v2710_v30 = vor.u32 %v3829_v20, %v2709_v19 }
  0x24   :  { %1035 = vmatpush.bf16.msrb.mxu0 %v2742_v62  ;;  %v2981_v23 = vld [vmem:[#allocation2 + $0x2a0] sm:$0xf]  ;;  %v3861_v25 = vld [vmem:[#allocation2 + $0x18c] sm:$0xf0] }
  0x25   :  { %1048 = vmatpush.bf16.msrb.mxu1 %v2870_v3  ;;  %v3109_v26 = vld [vmem:[#allocation2 + $0x3a0] sm:$0xf]  ;;  %v3929_v27 = vld [vmem:[#allocation2 + $0x3ac] sm:$0xf0]  ;;  %1061 = vmatpush.bf16.msrb.mxu2 %v2998_v13  ;;  %v2982_v28 = vor.u32 %v3897_v24, %v2981_v23  ;;  %v2838_v34 = vor.u32 %v3861_v25, %v2837_v22  ;;  %v2759_v22 = vld [vmem:[#allocation2 + $0xf0] sm:$0xf0] }
  0x26   :  { %1074 = vmatpush.bf16.msrb.mxu3 %v3126_v18  ;;  %v3110_v29 = vor.u32 %v3929_v27, %v3109_v26  ;;  %v2965_v31 = vld [vmem:[#allocation2 + $0x280] sm:$0xf]  ;;  %v3893_v32 = vld [vmem:[#allocation2 + $0x28c] sm:$0xf0]  ;;  %v3871_v23 = vld [vmem:[#allocation2 + $0x1e4] sm:$0xf] }
  0x27   :  { %v3093_v33 = vld [vmem:[#allocation2 + $0x380] sm:$0xf]  ;;  %v3825_v36 = vld [vmem:[#allocation2 + $0x6c] sm:$0xf0]  ;;  %v2966_v40 = vor.u32 %v3893_v32, %v2965_v31  ;;  %v2887_v27 = vld [vmem:[#allocation2 + $0x1f0] sm:$0xf0] }
  0x28   :  { %1036 = vmatpush.bf16.msrb.mxu0 %v2726_v17  ;;  %v2693_v35 = vld [vmem:[#allocation2 + $0x60] sm:$0xf]  ;;  %v3925_v37 = vld [vmem:[#allocation2 + $0x38c] sm:$0xf0]  ;;  %v3903_v32 = vld [vmem:[#allocation2 + $0x2e4] sm:$0xf] }
  0x29   :  { %1049 = vmatpush.bf16.msrb.mxu1 %v2854_v21  ;;  %v2821_v38 = vld [vmem:[#allocation2 + $0x160] sm:$0xf]  ;;  %v3857_v39 = vld [vmem:[#allocation2 + $0x16c] sm:$0xf0]  ;;  %1062 = vmatpush.bf16.msrb.mxu2 %v2982_v28  ;;  %v3094_v41 = vor.u32 %v3925_v37, %v3093_v33  ;;  %v2694_v44 = vor.u32 %v3825_v36, %v2693_v35  ;;  %v3839_v21 = vld [vmem:[#allocation2 + $0xe4] sm:$0xf] }
  0x2a   :  { %1075 = vmatpush.bf16.msrb.mxu3 %v3110_v29  ;;  %v2949_v42 = vld [vmem:[#allocation2 + $0x260] sm:$0xf]  ;;  %v3889_v45 = vld [vmem:[#allocation2 + $0x26c] sm:$0xf0]  ;;  %v2822_v49 = vor.u32 %v3857_v39, %v2821_v38  ;;  %v3015_v36 = vld [vmem:[#allocation2 + $0x2f0] sm:$0xf0]  ;;  %v2762_v39 = vor.u32 %v3839_v21, %v2759_v22 }
  0x2b   :  { %v3077_v46 = vld [vmem:[#allocation2 + $0x360] sm:$0xf]  ;;  %v3921_v47 = vld [vmem:[#allocation2 + $0x36c] sm:$0xf0]  ;;  %v2950_v55 = vor.u32 %v3889_v45, %v2949_v42  ;;  %v3935_v37 = vld [vmem:[#allocation2 + $0x3e4] sm:$0xf] }
  0x2c   :  { %1037 = vmatpush.bf16.msrb.mxu0 %v2710_v30  ;;  %v2677_v50 = vld [vmem:[#allocation2 + $0x40] sm:$0xf]  ;;  %v3821_v51 = vld [vmem:[#allocation2 + $0x4c] sm:$0xf0]  ;;  %v3078_v56 = vor.u32 %v3921_v47, %v3077_v46  ;;  %v3143_v38 = vld [vmem:[#allocation2 + $0x3f0] sm:$0xf0]  ;;  %v3018_v46 = vor.u32 %v3903_v32, %v3015_v36 }
  0x2d   :  { %1050 = vmatpush.bf16.msrb.mxu1 %v2838_v34  ;;  %v2805_v52 = vld [vmem:[#allocation2 + $0x140] sm:$0xf]  ;;  %v3853_v53 = vld [vmem:[#allocation2 + $0x14c] sm:$0xf0]  ;;  %1063 = vmatpush.bf16.msrb.mxu2 %v2966_v40  ;;  %v2678_v58 = vor.u32 %v3821_v51, %v2677_v50  ;;  %v2890_v40 = vor.u32 %v3871_v23, %v2887_v27  ;;  %v3867_v42 = vld [vmem:[#allocation2 + $0x1c4] sm:$0xf]  ;;  %v3146_v47 = vor.u32 %v3935_v37, %v3143_v38 }
  0x2e   :  { %1076 = vmatpush.bf16.msrb.mxu3 %v3094_v41  ;;  %v2933_v57 = vld [vmem:[#allocation2 + $0x240] sm:$0xf]  ;;  %v3885_v59 = vld [vmem:[#allocation2 + $0x24c] sm:$0xf0]  ;;  %v2806_v63 = vor.u32 %v3853_v53, %v2805_v52  ;;  %v3835_v41 = vld [vmem:[#allocation2 + $0xc4] sm:$0xf] }
  0x2f   :  { %v3061_v60 = vld [vmem:[#allocation2 + $0x340] sm:$0xf]  ;;  %v3917_v61 = vld [vmem:[#allocation2 + $0x34c] sm:$0xf0]  ;;  %v2934_v6 = vor.u32 %v3885_v59, %v2933_v57  ;;  %v3931_v50 = vld [vmem:[#allocation2 + $0x3c4] sm:$0xf] }
  0x30   :  { %1038 = vmatpush.bf16.msrb.mxu0 %v2694_v44  ;;  %v2661_v1 = vld [vmem:[#allocation2 + $0x20] sm:$0xf]  ;;  %v3817_v2 = vld [vmem:[#allocation2 + $0x2c] sm:$0xf0]  ;;  %v3062_v7 = vor.u32 %v3917_v61, %v3061_v60  ;;  %v3127_v51 = vld [vmem:[#allocation2 + $0x3d0] sm:$0xf0] }
  0x31   :  { %1051 = vmatpush.bf16.msrb.mxu1 %v2822_v49  ;;  %v2789_v3 = vld [vmem:[#allocation2 + $0x120] sm:$0xf]  ;;  %v3849_v4 = vld [vmem:[#allocation2 + $0x12c] sm:$0xf0]  ;;  %1064 = vmatpush.bf16.msrb.mxu2 %v2950_v55  ;;  %v2662_v9 = vor.u32 %v3817_v2, %v2661_v1  ;;  %v2999_v49 = vld [vmem:[#allocation2 + $0x2d0] sm:$0xf0]  ;;  %v3130_v59 = vor.u32 %v3931_v50, %v3127_v51 }
  0x32   :  { %1077 = vmatpush.bf16.msrb.mxu3 %v3078_v56  ;;  %v2917_v8 = vld [vmem:[#allocation2 + $0x220] sm:$0xf]  ;;  %v3881_v10 = vld [vmem:[#allocation2 + $0x22c] sm:$0xf0]  ;;  %v2790_v15 = vor.u32 %v3849_v4, %v2789_v3  ;;  %v2727_v55 = vld [vmem:[#allocation2 + $0xb0] sm:$0xf0] }
  0x33   :  { %v3045_v11 = vld [vmem:[#allocation2 + $0x320] sm:$0xf]  ;;  %v3813_v18 = vld [vmem:[#allocation2 + $0xc] sm:$0xf0]  ;;  %v2918_v24 = vor.u32 %v3881_v10, %v2917_v8  ;;  %v3863_v56 = vld [vmem:[#allocation2 + $0x1a4] sm:$0xf] }
  0x34   :  { %1039 = vmatpush.bf16.msrb.mxu0 %v2678_v58  ;;  %v2645_v17 = vld [vmem:[#allocation2] sm:$0xf]  ;;  %v3845_v20 = vld [vmem:[#allocation2 + $0x10c] sm:$0xf0]  ;;  %v2855_v57 = vld [vmem:[#allocation2 + $0x1b0] sm:$0xf0] }
  0x35   :  { %1052 = vmatpush.bf16.msrb.mxu1 %v2806_v63  ;;  %v2773_v19 = vld [vmem:[#allocation2 + $0x100] sm:$0xf]  ;;  %1065 = vmatpush.bf16.msrb.mxu2 %v2934_v6  ;;  %v3877_v29 = vld [vmem:[#allocation2 + $0x20c] sm:$0xf0]  ;;  %v2646_v34 = vor.u32 %v3813_v18, %v2645_v17  ;;  %v3895_v60 = vld [vmem:[#allocation2 + $0x2a4] sm:$0xf]  ;;  %v2858_v2 = vor.u32 %v3863_v56, %v2855_v57 }
  0x36   :  { %1078 = vmatpush.bf16.msrb.mxu3 %v3062_v7  ;;  %v2901_v28 = vld [vmem:[#allocation2 + $0x200] sm:$0xf]  ;;  %v3909_v31 = vld [vmem:[#allocation2 + $0x30c] sm:$0xf0]  ;;  %v2774_v35 = vor.u32 %v3845_v20, %v2773_v19  ;;  %v2983_v61 = vld [vmem:[#allocation2 + $0x2b0] sm:$0xf0] }
  0x37   :  { %v3029_v30 = vld [vmem:[#allocation2 + $0x300] sm:$0xf]  ;;  %v2902_v44 = vor.u32 %v3877_v29, %v2901_v28  ;;  %v3111_v63 = vld [vmem:[#allocation2 + $0x3b0] sm:$0xf0]  ;;  %v3827_v3 = vld [vmem:[#allocation2 + $0x84] sm:$0xf]  ;;  %v2986_v7 = vor.u32 %v3895_v60, %v2983_v61 }
  0x38   :  { %1040 = vmatpush.bf16.msrb.mxu0 %v2662_v9  ;;  %v3030_v45 = vor.u32 %v3909_v31, %v3029_v30  ;;  %v2711_v4 = vld [vmem:[#allocation2 + $0x90] sm:$0xf0]  ;;  %v3891_v9 = vld [vmem:[#allocation2 + $0x284] sm:$0xf] }
  0x39   :  { %1053 = vmatpush.bf16.msrb.mxu1 %v2790_v15  ;;  %1066 = vmatpush.bf16.msrb.mxu2 %v2918_v24  ;;  %v2839_v6 = vld [vmem:[#allocation2 + $0x190] sm:$0xf0]  ;;  %v3823_v15 = vld [vmem:[#allocation2 + $0x64] sm:$0xf] }
  0x3a   :  { %v2967_v10 = vld [vmem:[#allocation2 + $0x290] sm:$0xf0]  ;;  %v3855_v18 = vld [vmem:[#allocation2 + $0x164] sm:$0xf] }
  0x3b   :  { %v2695_v17 = vld [vmem:[#allocation2 + $0x70] sm:$0xf0]  ;;  %v2970_v20 = vor.u32 %v3891_v9, %v2967_v10  ;;  %v3819_v23 = vld [vmem:[#allocation2 + $0x44] sm:$0xf]  ;;  %v3842_v9 = vld [vmem:[#allocation2 + $0xf4] sm:$0xf0] }
  0x3c   :  { %1041 = vmatpush.bf16.msrb.mxu0 %v2646_v34  ;;  %v2823_v19 = vld [vmem:[#allocation2 + $0x170] sm:$0xf0]  ;;  %v2698_v21 = vor.u32 %v3823_v15, %v2695_v17  ;;  %v3887_v29 = vld [vmem:[#allocation2 + $0x264] sm:$0xf]  ;;  %v2893_v10 = vld [vmem:[#allocation2 + $0x1e8] sm:$0xf] }
  0x3d   :  { %1054 = vmatpush.bf16.msrb.mxu1 %v2774_v35  ;;  %1067 = vmatpush.bf16.msrb.mxu2 %v2902_v44  ;;  %v2826_v22 = vor.u32 %v3855_v18, %v2823_v19  ;;  %v2679_v24 = vld [vmem:[#allocation2 + $0x50] sm:$0xf0]  ;;  %v3919_v31 = vld [vmem:[#allocation2 + $0x364] sm:$0xf]  ;;  %v2749_v19 = vld [vmem:[#allocation2 + $0xc8] sm:$0xf] }
  0x3e   :  { %v2682_v27 = vor.u32 %v3819_v23, %v2679_v24  ;;  %v2951_v30 = vld [vmem:[#allocation2 + $0x270] sm:$0xf0]  ;;  %v3815_v35 = vld [vmem:[#allocation2 + $0x24] sm:$0xf]  ;;  %v3870_v23 = vld [vmem:[#allocation2 + $0x1d4] sm:$0xf0] }
  0x3f   :  { %v2954_v32 = vor.u32 %v3887_v29, %v2951_v30  ;;  %v2663_v36 = vld [vmem:[#allocation2 + $0x30] sm:$0xf0]  ;;  %v3847_v38 = vld [vmem:[#allocation2 + $0x124] sm:$0xf]  ;;  %v3149_v29 = vld [vmem:[#allocation2 + $0x3e8] sm:$0xf] }
  0x40   :  { %v2666_v37 = vor.u32 %v3815_v35, %v2663_v36  ;;  %v3063_v44 = vld [vmem:[#allocation2 + $0x350] sm:$0xf0]  ;;  %v3907_v61 = vld [vmem:[#allocation2 + $0x304] sm:$0xf]  ;;  %v3938_v35 = vld [vmem:[#allocation2 + $0x3f4] sm:$0xf0] }
  0x41   :  { %v2775_v50 = vld [vmem:[#allocation2 + $0x110] sm:$0xf0]  ;;  %v2733_v36 = vld [vmem:[#allocation2 + $0xa8] sm:$0xf] }
  0x42   :  { %v3047_v56 = vld [vmem:[#allocation2 + $0x330] sm:$0xf0] }
  0x83   :  { %v71_v12 = vpop.xlane.xlu0 %70 }
  0x84   :  { %v4349_v16 = vmax.f32 %v71_v12, 1e-12  ;;  %v3913_v12 = vld [vmem:[#allocation2 + $0x32c] sm:$0xf0] }
  0x85   :  { %v3046_v25 = vor.u32 %v3913_v12, %v3045_v11  ;;  %v3923_v11 = vld [vmem:[#allocation2 + $0x384] sm:$0xf]  ;;  %v3095_v12 = vld [vmem:[#allocation2 + $0x390] sm:$0xf0] }
  0x86   :  { %4105 = vrsqrt.f32 %v4349_v16  ;;  %vm79_vm2 = vweird.f32 %v4349_v16 }
  0x87   :  { %1079 = vmatpush.bf16.msrb.mxu3 %v3046_v25  ;;  %v3851_v25 = vld [vmem:[#allocation2 + $0x144] sm:$0xf] }
  0x8b   :  { %1080 = vmatpush.bf16.msrb.mxu3 %v3030_v45 }
  0x8c   :  { %v4106_v43 = vpop.eup %4105 }
  0x8d   :  { %v74_v48 = vmul.f32 %v4106_v43, %v4349_v16  ;;  %vm80_vm1 = vweird.f32 %v4106_v43 }
  0x8e   :  { %vm4355_vm3 = vmor %vm79_vm2, %vm80_vm1 }
  0x8f   :  { %v75_v54 = vmul.f32 %v4106_v43, %v74_v48  ;;  %v3899_v48 = vld [vmem:[#allocation2 + $0x2c4] sm:$0xf] }
  0x90   :  { %v3002_v58 = vor.u32 %v3899_v48, %v2999_v49  ;;  %v3843_v48 = vld [vmem:[#allocation2 + $0x104] sm:$0xf] }
  0x91   :  { %v76_v62 = vmul.f32 0.5, %v75_v54  ;;  %v3831_v54 = vld [vmem:[#allocation2 + $0xa4] sm:$0xf]  ;;  %v2778_v51 = vor.u32 %v3843_v48, %v2775_v50  ;;  %v3934_v50 = vld [vmem:[#allocation2 + $0x3d4] sm:$0xf0] }
  0x92   :  { %v2730_v1 = vor.u32 %v3831_v54, %v2727_v55  ;;  %v3911_v55 = vld [vmem:[#allocation2 + $0x324] sm:$0xf] }
  0x93   :  { %v77_v5 = vsub.f32 1.5, %v76_v62  ;;  %v3927_v62 = vld [vmem:[#allocation2 + $0x3a4] sm:$0xf]  ;;  %v3050_v57 = vor.u32 %v3911_v55, %v3047_v56 }
  0x94   :  { %v3114_v8 = vor.u32 %v3927_v62, %v3111_v63  ;;  %v3031_v62 = vld [vmem:[#allocation2 + $0x310] sm:$0xf0] }
  0x95   :  { %v78_v13 = vmul.f32 %v4106_v43, %v77_v5  ;;  %v3859_v5 = vld [vmem:[#allocation2 + $0x184] sm:$0xf]  ;;  %v3034_v63 = vor.u32 %v3907_v61, %v3031_v62  ;;  %v3898_v62 = vld [vmem:[#allocation2 + $0x2b4] sm:$0xf0] }
  0x96   :  { %v2842_v14 = vor.u32 %v3859_v5, %v2839_v6  ;;  %v2765_v6 = vld [vmem:[#allocation2 + $0xe8] sm:$0xf] }
  0x97   :  { %v82_v16 = vsel %vm4355_vm3, %v4106_v43, %v78_v13  ;;  %v2871_v43 = vld [vmem:[#allocation2 + $0x1d0] sm:$0xf0]  ;;  %v2714_v13 = vor.u32 %v3827_v3, %v2711_v4  ;;  %v2766_v17 = vor.u32 %v3842_v9, %v2765_v6  ;;  %v3894_v9 = vld [vmem:[#allocation2 + $0x294] sm:$0xf0] }
  0x98   :  { %v83_v26 = vmul.f32 %v82_v16, %v4249_v0  ;;  %v2743_v0 = vld [vmem:[#allocation2 + $0xd0] sm:$0xf0]  ;;  %v2874_v53 = vor.u32 %v3867_v42, %v2871_v43  ;;  %v3098_v16 = vor.u32 %v3923_v11, %v3095_v12  ;;  %v3915_v42 = vld [vmem:[#allocation2 + $0x344] sm:$0xf]  ;;  %v3874_v11 = vld [vmem:[#allocation2 + $0x1f4] sm:$0xf0] }
  0x99   :  { %v2746_v52 = vor.u32 %v3835_v41, %v2743_v0  ;;  %v3883_v41 = vld [vmem:[#allocation2 + $0x244] sm:$0xf]  ;;  %v2935_v0 = vld [vmem:[#allocation2 + $0x250] sm:$0xf0]  ;;  %v3066_v45 = vor.u32 %v3915_v42, %v3063_v44  ;;  %v2894_v18 = vor.u32 %v3874_v11, %v2893_v10  ;;  %v3150_v42 = vor.u32 %v3938_v35, %v3149_v29  ;;  %v3005_v44 = vld [vmem:[#allocation2 + $0x2c8] sm:$0xf] }
  0x9a   :  { %v84_v33 = vpack.c.bf16 %v83_v26, %v83_v26  ;;  %v2807_v26 = vld [vmem:[#allocation2 + $0x150] sm:$0xf0]  ;;  %v2938_v43 = vor.u32 %v3883_v41, %v2935_v0  ;;  %v3101_v10 = vld [vmem:[#allocation2 + $0x388] sm:$0xf]  ;;  %v3926_v11 = vld [vmem:[#allocation2 + $0x394] sm:$0xf0] }
  0x9b   :  { %v2810_v28 = vor.u32 %v3851_v25, %v2807_v26  ;;  %v3818_v29 = vld [vmem:[#allocation2 + $0x34] sm:$0xf0] }
  0x9c   :  { %2639 = vmatmul.msk.bf16.vlgmr.msra.gmra.mxu0 %vm192_vm4, %v84_v33  ;;  %2640 = vmatmul.msk.bf16.vlgmr.msra.gmra.mxu1 %vm192_vm4, %v84_v33  ;;  %v3886_v35 = vld [vmem:[#allocation2 + $0x254] sm:$0xf0] }
  0x9d   :  { %2641 = vmatmul.msk.bf16.vlgmr.msra.gmra.mxu2 %vm192_vm4, %v84_v33  ;;  %2642 = vmatmul.msk.bf16.vlgmr.msra.gmra.mxu3 %vm192_vm4, %v84_v33  ;;  %v3079_v33 = vld [vmem:[#allocation2 + $0x370] sm:$0xf0] }
  0x9e   :  { %1086 = vmatpush.bf16.msra.mxu0 %v2762_v39  ;;  %1099 = vmatpush.bf16.msra.mxu1 %v2890_v40  ;;  %v3082_v34 = vor.u32 %v3919_v31, %v3079_v33  ;;  %v2791_v39 = vld [vmem:[#allocation2 + $0x130] sm:$0xf0] }
  0x9f   :  { %1112 = vmatpush.bf16.msra.mxu2 %v3018_v46  ;;  %1125 = vmatpush.bf16.msra.mxu3 %v3146_v47  ;;  %v2794_v40 = vor.u32 %v3847_v38, %v2791_v39  ;;  %v3811_v46 = vld [vmem:[#allocation2 + $0x4] sm:$0xf]  ;;  %v2647_v47 = vld [vmem:[#allocation2 + $0x10] sm:$0xf0]  ;;  %v2861_v38 = vld [vmem:[#allocation2 + $0x1a8] sm:$0xf] }
  0xa0   :  { %v2650_v49 = vor.u32 %v3811_v46, %v2647_v47  ;;  %v3866_v39 = vld [vmem:[#allocation2 + $0x1b4] sm:$0xf0] }
  0xa1   :  { %v2862_v48 = vor.u32 %v3866_v39, %v2861_v38 }
  0xa2   :  { %1087 = vmatpush.bf16.msra.mxu0 %v2746_v52  ;;  %1100 = vmatpush.bf16.msra.mxu1 %v2874_v53  ;;  %v3879_v52 = vld [vmem:[#allocation2 + $0x224] sm:$0xf]  ;;  %v2919_v53 = vld [vmem:[#allocation2 + $0x230] sm:$0xf0] }
  0xa3   :  { %1113 = vmatpush.bf16.msra.mxu2 %v3002_v58  ;;  %1126 = vmatpush.bf16.msra.mxu3 %v3130_v59  ;;  %v2922_v54 = vor.u32 %v3879_v52, %v2919_v53  ;;  %v3875_v58 = vld [vmem:[#allocation2 + $0x204] sm:$0xf]  ;;  %v2903_v59 = vld [vmem:[#allocation2 + $0x210] sm:$0xf0]  ;;  %v3830_v52 = vld [vmem:[#allocation2 + $0x94] sm:$0xf0] }
  0xa4   :  { %v2906_v60 = vor.u32 %v3875_v58, %v2903_v59  ;;  %v2845_v53 = vld [vmem:[#allocation2 + $0x188] sm:$0xf] }
  0xa5   :  { %v2989_v59 = vld [vmem:[#allocation2 + $0x2a8] sm:$0xf] }
  0xa6   :  { %1088 = vmatpush.bf16.msra.mxu0 %v2730_v1  ;;  %1101 = vmatpush.bf16.msra.mxu1 %v2858_v2  ;;  %v102_v1 = vld [vmem:[%s4551_s2] sm:$0xf]  ;;  %v2990_v6 = vor.u32 %v3898_v62, %v2989_v59  ;;  %v3836_v59 = vld [vmem:[#allocation2 + $0xcc] sm:$0xf] }
  0xa7   :  { %1114 = vmatpush.bf16.msra.mxu2 %v2986_v7  ;;  %1127 = vmatpush.bf16.msra.mxu3 %v3114_v8  ;;  %v104_v2 = vperm.slane %v102_v1, 0  ;;  %v105_v3 = vperm.slane %v102_v1, 1  ;;  %v107_v15 = vperm.slane %v102_v1, 3 }
  0xaa   :  { %1089 = vmatpush.bf16.msra.mxu0 %v2714_v13  ;;  %1102 = vmatpush.bf16.msra.mxu1 %v2842_v14  ;;  %v106_v14 = vperm.slane %v102_v1, 2  ;;  %v3930_v1 = vld [vmem:[#allocation2 + $0x3b4] sm:$0xf0] }
  0xab   :  { %1115 = vmatpush.bf16.msra.mxu2 %v2970_v20  ;;  %1128 = vmatpush.bf16.msra.mxu3 %v3098_v16  ;;  %v3838_v20 = vld [vmem:[#allocation2 + $0xd4] sm:$0xf0] }
  0xac   :  { %v2750_v26 = vor.u32 %v3838_v20, %v2749_v19  ;;  %v3102_v20 = vor.u32 %v3926_v11, %v3101_v10 }
  0xae   :  { %1090 = vmatpush.bf16.msra.mxu0 %v2698_v21  ;;  %1103 = vmatpush.bf16.msra.mxu1 %v2826_v22  ;;  %v2877_v22 = vld [vmem:[#allocation2 + $0x1c8] sm:$0xf] }
  0xaf   :  { %1116 = vmatpush.bf16.msra.mxu2 %v2954_v32  ;;  %1129 = vmatpush.bf16.msra.mxu3 %v3082_v34  ;;  %v2878_v34 = vor.u32 %v3870_v23, %v2877_v22  ;;  %v2957_v22 = vld [vmem:[#allocation2 + $0x268] sm:$0xf]  ;;  %v3890_v23 = vld [vmem:[#allocation2 + $0x274] sm:$0xf0] }
  0xb2   :  { %1091 = vmatpush.bf16.msra.mxu0 %v2682_v27  ;;  %1104 = vmatpush.bf16.msra.mxu1 %v2810_v28  ;;  %v3021_v27 = vld [vmem:[#allocation2 + $0x2e8] sm:$0xf]  ;;  %v3906_v28 = vld [vmem:[#allocation2 + $0x2f4] sm:$0xf0] }
  0xb3   :  { %1117 = vmatpush.bf16.msra.mxu2 %v2938_v43  ;;  %1130 = vmatpush.bf16.msra.mxu3 %v3066_v45  ;;  %v3022_v0 = vor.u32 %v3906_v28, %v3021_v27  ;;  %v3902_v45 = vld [vmem:[#allocation2 + $0x2d4] sm:$0xf0]  ;;  %v2669_v28 = vld [vmem:[#allocation2 + $0x28] sm:$0xf] }
  0xb4   :  { %v2670_v38 = vor.u32 %v3818_v29, %v2669_v28  ;;  %v3828_v28 = vld [vmem:[#allocation2 + $0x8c] sm:$0xf]  ;;  %v2719_v29 = vld [vmem:[#allocation2 + $0x98] sm:$0xf0] }
  0xb6   :  { %1092 = vmatpush.bf16.msra.mxu0 %v2666_v37  ;;  %1105 = vmatpush.bf16.msra.mxu1 %v2794_v40  ;;  %v3834_v37 = vld [vmem:[#allocation2 + $0xb4] sm:$0xf0] }
  0xb7   :  { %1118 = vmatpush.bf16.msra.mxu2 %v2922_v54  ;;  %1131 = vmatpush.bf16.msra.mxu3 %v3050_v57  ;;  %v2734_v43 = vor.u32 %v3834_v37, %v2733_v36  ;;  %v3862_v54 = vld [vmem:[#allocation2 + $0x194] sm:$0xf0]  ;;  %v3006_v57 = vor.u32 %v3902_v45, %v3005_v44  ;;  %v3069_v36 = vld [vmem:[#allocation2 + $0x348] sm:$0xf]  ;;  %v2767_v44 = vld [vmem:[#allocation2 + $0xf8] sm:$0xf0] }
  0xb8   :  { %v2846_v61 = vor.u32 %v3862_v54, %v2845_v53  ;;  %v3918_v37 = vld [vmem:[#allocation2 + $0x354] sm:$0xf0]  ;;  %v3053_v53 = vld [vmem:[#allocation2 + $0x328] sm:$0xf] }
  0xb9   :  { %v3914_v54 = vld [vmem:[#allocation2 + $0x334] sm:$0xf0] }
  0xba   :  { %1093 = vmatpush.bf16.msra.mxu0 %v2650_v49  ;;  %1106 = vmatpush.bf16.msra.mxu1 %v2778_v51  ;;  %v3133_v49 = vld [vmem:[#allocation2 + $0x3c8] sm:$0xf] }
  0xbb   :  { %1119 = vmatpush.bf16.msra.mxu2 %v2906_v60  ;;  %1132 = vmatpush.bf16.msra.mxu3 %v3034_v63  ;;  %v2717_v51 = vld [vmem:[#allocation2 + $0x88] sm:$0xf]  ;;  %v3134_v58 = vor.u32 %v3934_v50, %v3133_v49  ;;  %v3872_v49 = vld [vmem:[#allocation2 + $0x1ec] sm:$0xf]  ;;  %v2895_v50 = vld [vmem:[#allocation2 + $0x1f8] sm:$0xf0] }
  0xbc   :  { %v2718_v60 = vor.u32 %v3830_v52, %v2717_v51  ;;  %v3117_v63 = vld [vmem:[#allocation2 + $0x3a8] sm:$0xf]  ;;  %v3882_v52 = vld [vmem:[#allocation2 + $0x234] sm:$0xf0] }
  0xbd   :  { %v2925_v51 = vld [vmem:[#allocation2 + $0x228] sm:$0xf] }
  0xbe   :  { %v2926_v62 = vor.u32 %v3882_v52, %v2925_v51 }
 0x119   :  { %v205_v4 = vpop.f32.mrf.mxu0  ;;  %v218_v5 = vpop.f32.mrf.mxu1 }
 0x11a   :  { %v206_v7 = vadd.f32 %v205_v4, %v104_v2  ;;  %v219_v8 = vadd.f32 %v218_v5, %v105_v3  ;;  %v2701_v2 = vld [vmem:[#allocation2 + $0x68] sm:$0xf]  ;;  %v3826_v3 = vld [vmem:[#allocation2 + $0x74] sm:$0xf0] }
 0x11b   :  { %v2829_v4 = vld [vmem:[#allocation2 + $0x168] sm:$0xf]  ;;  %v3858_v5 = vld [vmem:[#allocation2 + $0x174] sm:$0xf0] }
 0x11c   :  { %v248_v12 = vmax.f32 %v206_v7, 0.0  ;;  %v249_v13 = vmax.f32 %v219_v8, 0.0  ;;  %v3118_v7 = vor.u32 %v3930_v1, %v3117_v63  ;;  %v2973_v8 = vld [vmem:[#allocation2 + $0x288] sm:$0xf]  ;;  %v3054_v63 = vor.u32 %v3914_v54, %v3053_v53  ;;  %v2879_v1 = vld [vmem:[#allocation2 + $0x1d8] sm:$0xf0] }
 0x11d   :  { %v2974_v19 = vor.u32 %v3894_v9, %v2973_v8  ;;  %v3936_v8 = vld [vmem:[#allocation2 + $0x3ec] sm:$0xf]  ;;  %v3151_v9 = vld [vmem:[#allocation2 + $0x3f8] sm:$0xf0] }
 0x11e   :  { %v4369_v16 = vpack.c.bf16 %v248_v12, %v248_v12  ;;  %v4371_v21 = vpack.c.bf16 %v249_v13, %v249_v13  ;;  %v2702_v12 = vor.u32 %v3826_v3, %v2701_v2  ;;  %v2830_v13 = vor.u32 %v3858_v5, %v2829_v4  ;;  %v2909_v2 = vld [vmem:[#allocation2 + $0x208] sm:$0xf]  ;;  %v3878_v3 = vld [vmem:[#allocation2 + $0x214] sm:$0xf0]  ;;  %v3820_v53 = vld [vmem:[#allocation2 + $0x4c] sm:$0xf] }
 0x11f   :  { %v3037_v4 = vld [vmem:[#allocation2 + $0x308] sm:$0xf]  ;;  %v3910_v5 = vld [vmem:[#allocation2 + $0x314] sm:$0xf0]  ;;  %v2687_v54 = vld [vmem:[#allocation2 + $0x58] sm:$0xf0] }
 0x120   :  { %v231_v24 = vpop.f32.mrf.mxu2  ;;  %v244_v25 = vpop.f32.mrf.mxu3  ;;  %1042 = vmatmul.bf16.vlgmr.msrb.gmra.mxu0 %v4369_v16  ;;  %1055 = vmatmul.bf16.vlgmr.msrb.gmra.mxu1 %v4371_v21 }
 0x121   :  { %v232_v30 = vadd.f32 %v231_v24, %v106_v14  ;;  %v245_v31 = vadd.f32 %v244_v25, %v107_v15  ;;  %1138 = vmatpush.bf16.msrb.mxu0 %v2766_v17  ;;  %1151 = vmatpush.bf16.msrb.mxu1 %v2894_v18  ;;  %v207_v32 = vpop.f32.mrf.mxu0  ;;  %v220_v33 = vpop.f32.mrf.mxu1  ;;  %v2685_v14 = vld [vmem:[#allocation2 + $0x48] sm:$0xf]  ;;  %v3822_v15 = vld [vmem:[#allocation2 + $0x54] sm:$0xf0] }
 0x122   :  { %v2813_v17 = vld [vmem:[#allocation2 + $0x148] sm:$0xf]  ;;  %v3854_v18 = vld [vmem:[#allocation2 + $0x154] sm:$0xf0]  ;;  %v2958_v32 = vor.u32 %v3890_v23, %v2957_v22  ;;  %v3900_v22 = vld [vmem:[#allocation2 + $0x2cc] sm:$0xf] }
 0x123   :  { %v250_v40 = vmax.f32 %v232_v30, 0.0  ;;  %v251_v41 = vmax.f32 %v245_v31, 0.0  ;;  %v3085_v24 = vld [vmem:[#allocation2 + $0x368] sm:$0xf]  ;;  %v3922_v25 = vld [vmem:[#allocation2 + $0x374] sm:$0xf0]  ;;  %v2814_v27 = vor.u32 %v3854_v18, %v2813_v17 }
 0x124   :  { %v2797_v30 = vld [vmem:[#allocation2 + $0x128] sm:$0xf]  ;;  %v3850_v31 = vld [vmem:[#allocation2 + $0x134] sm:$0xf0]  ;;  %v3086_v33 = vor.u32 %v3922_v25, %v3085_v24  ;;  %v3864_v17 = vld [vmem:[#allocation2 + $0x1ac] sm:$0xf] }
 0x125   :  { %v4375_v46 = vpack.c.bf16 %v250_v40, %v250_v40  ;;  %v4377_v47 = vpack.c.bf16 %v251_v41, %v251_v41  ;;  %1139 = vmatpush.bf16.msrb.mxu0 %v2750_v26  ;;  %1152 = vmatpush.bf16.msrb.mxu1 %v2878_v34  ;;  %v2686_v26 = vor.u32 %v3822_v15, %v2685_v14  ;;  %v2941_v34 = vld [vmem:[#allocation2 + $0x248] sm:$0xf]  ;;  %v3814_v41 = vld [vmem:[#allocation2 + $0x14] sm:$0xf0]  ;;  %v2735_v15 = vld [vmem:[#allocation2 + $0xb8] sm:$0xf0] }
 0x126   :  { %v2798_v39 = vor.u32 %v3850_v31, %v2797_v30  ;;  %v2653_v40 = vld [vmem:[#allocation2 + $0x8] sm:$0xf]  ;;  %v2942_v45 = vor.u32 %v3886_v35, %v2941_v34  ;;  %v3038_v14 = vor.u32 %v3910_v5, %v3037_v4  ;;  %v2863_v18 = vld [vmem:[#allocation2 + $0x1b8] sm:$0xf0]  ;;  %v3932_v24 = vld [vmem:[#allocation2 + $0x3cc] sm:$0xf] }
 0x127   :  { %1068 = vmatmul.bf16.vlgmr.msrb.gmra.mxu2 %v4375_v46  ;;  %1081 = vmatmul.bf16.vlgmr.msrb.gmra.mxu3 %v4377_v47  ;;  %v3007_v23 = vld [vmem:[#allocation2 + $0x2d8] sm:$0xf0]  ;;  %v3860_v30 = vld [vmem:[#allocation2 + $0x18c] sm:$0xf] }
 0x128   :  { %1164 = vmatpush.bf16.msrb.mxu2 %v3022_v0  ;;  %1177 = vmatpush.bf16.msrb.mxu3 %v3150_v42  ;;  %v233_v55 = vpop.f32.mrf.mxu2  ;;  %v246_v56 = vpop.f32.mrf.mxu3  ;;  %v2781_v0 = vld [vmem:[#allocation2 + $0x108] sm:$0xf]  ;;  %v3846_v42 = vld [vmem:[#allocation2 + $0x114] sm:$0xf0]  ;;  %v3135_v25 = vld [vmem:[#allocation2 + $0x3d8] sm:$0xf0] }
 0x129   :  { %1140 = vmatpush.bf16.msrb.mxu0 %v2734_v43  ;;  %1153 = vmatpush.bf16.msrb.mxu1 %v2862_v48  ;;  %v3840_v43 = vld [vmem:[#allocation2 + $0xec] sm:$0xf]  ;;  %v3070_v48 = vor.u32 %v3918_v37, %v3069_v36  ;;  %v2654_v55 = vor.u32 %v3814_v41, %v2653_v40  ;;  %v2782_v56 = vor.u32 %v3846_v42, %v2781_v0  ;;  %v2847_v31 = vld [vmem:[#allocation2 + $0x198] sm:$0xf0] }
 0x12a   :  { %v3896_v34 = vld [vmem:[#allocation2 + $0x2ac] sm:$0xf]  ;;  %v2991_v35 = vld [vmem:[#allocation2 + $0x2b8] sm:$0xf0] }
 0x12b   :  { %v3928_v36 = vld [vmem:[#allocation2 + $0x3ac] sm:$0xf]  ;;  %v3119_v37 = vld [vmem:[#allocation2 + $0x3b8] sm:$0xf0] }
 0x12c   :  { %1165 = vmatpush.bf16.msrb.mxu2 %v3006_v57  ;;  %1178 = vmatpush.bf16.msrb.mxu3 %v3134_v58  ;;  %v2770_v57 = vor.u32 %v3840_v43, %v2767_v44  ;;  %v2898_v58 = vor.u32 %v3872_v49, %v2895_v50  ;;  %v3824_v40 = vld [vmem:[#allocation2 + $0x6c] sm:$0xf]  ;;  %v2703_v41 = vld [vmem:[#allocation2 + $0x78] sm:$0xf0]  ;;  %v2994_v43 = vor.u32 %v3896_v34, %v2991_v35  ;;  %v3253_v34 = vld [vmem:[#allocation5 + $0xc0] sm:$0xf] }
 0x12d   :  { %1141 = vmatpush.bf16.msrb.mxu0 %v2718_v60  ;;  %1154 = vmatpush.bf16.msrb.mxu1 %v2846_v61  ;;  %v2751_v60 = vld [vmem:[#allocation2 + $0xd8] sm:$0xf0]  ;;  %v3868_v61 = vld [vmem:[#allocation2 + $0x1cc] sm:$0xf]  ;;  %v3122_v44 = vor.u32 %v3928_v36, %v3119_v37  ;;  %v2706_v51 = vor.u32 %v3824_v40, %v2703_v41  ;;  %v3997_v40 = vld [vmem:[#allocation5 + $0x1cc] sm:$0xf0] }
 0x12e   :  { %v2754_v10 = vor.u32 %v3836_v59, %v2751_v60  ;;  %v2882_v11 = vor.u32 %v3868_v61, %v2879_v1  ;;  %v3856_v0 = vld [vmem:[#allocation2 + $0x16c] sm:$0xf]  ;;  %v2831_v42 = vld [vmem:[#allocation2 + $0x178] sm:$0xf0] }
 0x12f   :  { %v3924_v49 = vld [vmem:[#allocation2 + $0x38c] sm:$0xf]  ;;  %v3103_v50 = vld [vmem:[#allocation2 + $0x398] sm:$0xf0]  ;;  %v2834_v52 = vor.u32 %v3856_v0, %v2831_v42 }
 0x130   :  { %1166 = vmatpush.bf16.msrb.mxu2 %v2990_v6  ;;  %1179 = vmatpush.bf16.msrb.mxu3 %v3118_v7  ;;  %v3904_v6 = vld [vmem:[#allocation2 + $0x2ec] sm:$0xf]  ;;  %v3023_v7 = vld [vmem:[#allocation2 + $0x2f8] sm:$0xf0] }
 0x131   :  { %1094 = vmatmul.bf16.vlgmr.msra.gmra.mxu0 %v4369_v16  ;;  %1107 = vmatmul.bf16.vlgmr.msra.gmra.mxu1 %v4371_v21  ;;  %v3888_v59 = vld [vmem:[#allocation2 + $0x26c] sm:$0xf]  ;;  %v2959_v60 = vld [vmem:[#allocation2 + $0x278] sm:$0xf0] }
 0x132   :  { %1142 = vmatpush.bf16.msrb.mxu0 %v2702_v12  ;;  %1155 = vmatpush.bf16.msrb.mxu1 %v2830_v13  ;;  %v3832_v12 = vld [vmem:[#allocation2 + $0xac] sm:$0xf]  ;;  %v2910_v13 = vor.u32 %v3878_v3, %v2909_v2  ;;  %v2671_v3 = vld [vmem:[#allocation2 + $0x38] sm:$0xf0] }
 0x133   :  { %v3920_v61 = vld [vmem:[#allocation2 + $0x36c] sm:$0xf]  ;;  %v2799_v5 = vld [vmem:[#allocation2 + $0x138] sm:$0xf0] }
 0x134   :  { %1167 = vmatpush.bf16.msrb.mxu2 %v2974_v19  ;;  %1180 = vmatpush.bf16.msrb.mxu3 %v3102_v20  ;;  %v3026_v19 = vor.u32 %v3904_v6, %v3023_v7  ;;  %v3154_v20 = vor.u32 %v3936_v8, %v3151_v9  ;;  %v3816_v2 = vld [vmem:[#allocation2 + $0x2c] sm:$0xf]  ;;  %v2962_v6 = vor.u32 %v3888_v59, %v2959_v60  ;;  %v2943_v9 = vld [vmem:[#allocation2 + $0x258] sm:$0xf0]  ;;  %v3221_v59 = vld [vmem:[#allocation5 + $0x80] sm:$0xf] }
 0x135   :  { %v3848_v4 = vld [vmem:[#allocation2 + $0x12c] sm:$0xf]  ;;  %v2911_v41 = vld [vmem:[#allocation2 + $0x218] sm:$0xf0] }
 0x136   :  { %1143 = vmatpush.bf16.msrb.mxu0 %v2686_v26  ;;  %1156 = vmatpush.bf16.msrb.mxu1 %v2814_v27  ;;  %v2738_v26 = vor.u32 %v3832_v12, %v2735_v15  ;;  %v2866_v27 = vor.u32 %v3864_v17, %v2863_v18  ;;  %v3884_v8 = vld [vmem:[#allocation2 + $0x24c] sm:$0xf]  ;;  %v2674_v12 = vor.u32 %v3816_v2, %v2671_v3  ;;  %v2655_v15 = vld [vmem:[#allocation2 + $0x18] sm:$0xf0]  ;;  %v3953_v3 = vld [vmem:[#allocation5 + $0x6c] sm:$0xf0] }
 0x137   :  { %1120 = vmatmul.bf16.vlgmr.msra.gmra.mxu2 %v4375_v46  ;;  %1133 = vmatmul.bf16.vlgmr.msra.gmra.mxu3 %v4377_v47  ;;  %v3844_v17 = vld [vmem:[#allocation2 + $0x10c] sm:$0xf]  ;;  %v2783_v18 = vld [vmem:[#allocation2 + $0x118] sm:$0xf0] }
 0x138   :  { %1168 = vmatpush.bf16.msrb.mxu2 %v2958_v32  ;;  %1181 = vmatpush.bf16.msrb.mxu3 %v3086_v33  ;;  %v3010_v32 = vor.u32 %v3900_v22, %v3007_v23  ;;  %v3138_v33 = vor.u32 %v3932_v24, %v3135_v25  ;;  %v2946_v22 = vor.u32 %v3884_v8, %v2943_v9  ;;  %v3969_v24 = vld [vmem:[#allocation5 + $0xec] sm:$0xf0]  ;;  %v3397_v25 = vld [vmem:[#allocation5 + $0x1e0] sm:$0xf]  ;;  %v3908_v0 = vld [vmem:[#allocation2 + $0x30c] sm:$0xf] }
 0x139   :  { %v3039_v42 = vld [vmem:[#allocation2 + $0x318] sm:$0xf0]  ;;  %v3949_v9 = vld [vmem:[#allocation5 + $0x4c] sm:$0xf0] }
 0x13a   :  { %1144 = vmatpush.bf16.msrb.mxu0 %v2670_v38  ;;  %1157 = vmatpush.bf16.msrb.mxu1 %v2798_v39  ;;  %v2722_v38 = vor.u32 %v3828_v28, %v2719_v29  ;;  %v2850_v39 = vor.u32 %v3860_v30, %v2847_v31  ;;  %v3912_v28 = vld [vmem:[#allocation2 + $0x32c] sm:$0xf]  ;;  %v3055_v29 = vld [vmem:[#allocation2 + $0x338] sm:$0xf0]  ;;  %v2786_v31 = vor.u32 %v3844_v17, %v2783_v18  ;;  %v3941_v17 = vld [vmem:[#allocation5 + $0xc] sm:$0xf0] }
 0x13b   :  { %v3058_v37 = vor.u32 %v3912_v28, %v3055_v29  ;;  %v3967_v18 = vld [vmem:[#allocation5 + $0xe4] sm:$0xf]  ;;  %v3301_v29 = vld [vmem:[#allocation5 + $0x120] sm:$0xf] }
 0x13c   :  { %1169 = vmatpush.bf16.msrb.mxu2 %v2942_v45  ;;  %1182 = vmatpush.bf16.msrb.mxu3 %v3070_v48  ;;  %v3892_v45 = vld [vmem:[#allocation2 + $0x28c] sm:$0xf]  ;;  %v2975_v48 = vld [vmem:[#allocation2 + $0x298] sm:$0xf0] }
 0x13e   :  { %1145 = vmatpush.bf16.msrb.mxu0 %v2654_v55  ;;  %1158 = vmatpush.bf16.msrb.mxu1 %v2782_v56  ;;  %v3852_v55 = vld [vmem:[#allocation2 + $0x14c] sm:$0xf]  ;;  %v2815_v56 = vld [vmem:[#allocation2 + $0x158] sm:$0xf0] }
 0x13f   :  { %v2818_v1 = vor.u32 %v3852_v55, %v2815_v56  ;;  %v3509_v56 = vld [vmem:[#allocation5 + $0x2c0] sm:$0xf] }
 0x140   :  { %1170 = vmatpush.bf16.msrb.mxu2 %v2926_v62  ;;  %1183 = vmatpush.bf16.msrb.mxu3 %v3054_v63  ;;  %v3087_v62 = vld [vmem:[#allocation2 + $0x378] sm:$0xf0]  ;;  %v2690_v63 = vor.u32 %v3820_v53, %v2687_v54  ;;  %v3365_v53 = vld [vmem:[#allocation5 + $0x1a0] sm:$0xf]  ;;  %v3993_v54 = vld [vmem:[#allocation5 + $0x1ac] sm:$0xf0] }
 0x141   :  { %1146 = vmatmul.bf16.vlgmr.msrb.gmra.mxu0 %v4369_v16  ;;  %1159 = vmatmul.bf16.vlgmr.msrb.gmra.mxu1 %v4371_v21  ;;  %v3090_v7 = vor.u32 %v3920_v61, %v3087_v62  ;;  %v3366_v60 = vor.u32 %v3993_v54, %v3365_v53  ;;  %v3957_v61 = vld [vmem:[#allocation5 + $0x8c] sm:$0xf0]  ;;  %v3349_v62 = vld [vmem:[#allocation5 + $0x180] sm:$0xf]  ;;  %v3947_v54 = vld [vmem:[#allocation5 + $0x44] sm:$0xf] }
 0x142   :  { %1190 = vmatpush.bf16.msra.mxu0 %v2770_v57  ;;  %1203 = vmatpush.bf16.msra.mxu1 %v2898_v58  ;;  %v2978_v57 = vor.u32 %v3892_v45, %v2975_v48  ;;  %v3106_v58 = vor.u32 %v3924_v49, %v3103_v50  ;;  %v3042_v50 = vor.u32 %v3908_v0, %v3039_v42  ;;  %v4021_v0 = vld [vmem:[#allocation5 + $0x28c] sm:$0xf0] }
 0x144   :  { %1171 = vmatpush.bf16.msrb.mxu2 %v2910_v13  ;;  %1184 = vmatpush.bf16.msrb.mxu3 %v3038_v14  ;;  %v2802_v13 = vor.u32 %v3848_v4, %v2799_v5  ;;  %v3812_v14 = vld [vmem:[#allocation2 + $0xc] sm:$0xf]  ;;  %v3333_v4 = vld [vmem:[#allocation5 + $0x160] sm:$0xf]  ;;  %v3985_v5 = vld [vmem:[#allocation5 + $0x16c] sm:$0xf0] }
 0x145   :  { %v2658_v30 = vor.u32 %v3812_v14, %v2655_v15  ;;  %v3334_v8 = vor.u32 %v3985_v5, %v3333_v4  ;;  %v3157_v15 = vld [vmem:[#allocation5] sm:$0xf]  ;;  %v4009_v5 = vld [vmem:[#allocation5 + $0x22c] sm:$0xf0] }
 0x146   :  { %1191 = vmatpush.bf16.msra.mxu0 %v2754_v10  ;;  %1204 = vmatpush.bf16.msra.mxu1 %v2882_v11  ;;  %v3916_v10 = vld [vmem:[#allocation2 + $0x34c] sm:$0xf]  ;;  %v3071_v11 = vld [vmem:[#allocation2 + $0x358] sm:$0xf0]  ;;  %v3429_v4 = vld [vmem:[#allocation5 + $0x220] sm:$0xf] }
 0x147   :  { %1172 = vmatmul.bf16.vlgmr.msrb.gmra.mxu2 %v4375_v46  ;;  %1185 = vmatmul.bf16.vlgmr.msrb.gmra.mxu3 %v4377_v47  ;;  %v3074_v23 = vor.u32 %v3916_v10, %v3071_v11  ;;  %v3317_v10 = vld [vmem:[#allocation5 + $0x140] sm:$0xf]  ;;  %v3981_v11 = vld [vmem:[#allocation5 + $0x14c] sm:$0xf0] }
 0x148   :  { %1216 = vmatpush.bf16.msra.mxu2 %v3026_v19  ;;  %1229 = vmatpush.bf16.msra.mxu3 %v3154_v20  ;;  %v3880_v19 = vld [vmem:[#allocation2 + $0x22c] sm:$0xf]  ;;  %v3269_v20 = vld [vmem:[#allocation5 + $0xe0] sm:$0xf] }
 0x14a   :  { %1192 = vmatpush.bf16.msra.mxu0 %v2738_v26  ;;  %1205 = vmatpush.bf16.msra.mxu1 %v2866_v27  ;;  %v4001_v26 = vld [vmem:[#allocation5 + $0x1ec] sm:$0xf0]  ;;  %v2927_v27 = vld [vmem:[#allocation2 + $0x238] sm:$0xf0] }
 0x14b   :  { %v3398_v35 = vor.u32 %v4001_v26, %v3397_v25  ;;  %v2930_v36 = vor.u32 %v3880_v19, %v2927_v27  ;;  %v3271_v19 = vld [vmem:[#allocation5 + $0xf0] sm:$0xf0]  ;;  %v3959_v26 = vld [vmem:[#allocation5 + $0xa4] sm:$0xf] }
 0x14c   :  { %1217 = vmatpush.bf16.msra.mxu2 %v3010_v32  ;;  %1230 = vmatpush.bf16.msra.mxu3 %v3138_v33  ;;  %v3876_v32 = vld [vmem:[#allocation2 + $0x20c] sm:$0xf]  ;;  %v3270_v33 = vor.u32 %v3969_v24, %v3269_v20  ;;  %v3158_v20 = vor.u32 %v3941_v17, %v3157_v15  ;;  %v3255_v24 = vld [vmem:[#allocation5 + $0xd0] sm:$0xf0]  ;;  %v4065_v15 = vld [vmem:[#allocation5 + $0x3ec] sm:$0xf0] }
 0x14d   :  { %v2914_v49 = vor.u32 %v3876_v32, %v2911_v41  ;;  %v3239_v27 = vld [vmem:[#allocation5 + $0xb0] sm:$0xf0]  ;;  %v3983_v17 = vld [vmem:[#allocation5 + $0x164] sm:$0xf] }
 0x14e   :  { %1193 = vmatpush.bf16.msra.mxu0 %v2722_v38  ;;  %1206 = vmatpush.bf16.msra.mxu1 %v2850_v39  ;;  %v3965_v38 = vld [vmem:[#allocation5 + $0xcc] sm:$0xf0]  ;;  %v3381_v39 = vld [vmem:[#allocation5 + $0x1c0] sm:$0xf]  ;;  %v3242_v28 = vor.u32 %v3959_v26, %v3239_v27 }
 0x14f   :  { %v3254_v45 = vor.u32 %v3965_v38, %v3253_v34  ;;  %v3382_v48 = vor.u32 %v3997_v40, %v3381_v39  ;;  %v3955_v34 = vld [vmem:[#allocation5 + $0x84] sm:$0xf]  ;;  %v3973_v38 = vld [vmem:[#allocation5 + $0x10c] sm:$0xf0]  ;;  %v3477_v39 = vld [vmem:[#allocation5 + $0x280] sm:$0xf] }
 0x150   :  { %1218 = vmatpush.bf16.msra.mxu2 %v2994_v43  ;;  %1231 = vmatpush.bf16.msra.mxu3 %v3122_v44  ;;  %v3525_v43 = vld [vmem:[#allocation5 + $0x2e0] sm:$0xf]  ;;  %v4033_v44 = vld [vmem:[#allocation5 + $0x2ec] sm:$0xf0]  ;;  %v3478_v42 = vor.u32 %v4021_v0, %v3477_v39  ;;  %v4023_v39 = vld [vmem:[#allocation5 + $0x2a4] sm:$0xf] }
 0x151   :  { %v3526_v55 = vor.u32 %v4033_v44, %v3525_v43  ;;  %v3951_v43 = vld [vmem:[#allocation5 + $0x64] sm:$0xf]  ;;  %v3207_v44 = vld [vmem:[#allocation5 + $0x70] sm:$0xf0]  ;;  %v4061_v26 = vld [vmem:[#allocation5 + $0x3cc] sm:$0xf0] }
 0x152   :  { %1194 = vmatpush.bf16.msra.mxu0 %v2706_v51  ;;  %1207 = vmatpush.bf16.msra.mxu1 %v2834_v52  ;;  %v3237_v51 = vld [vmem:[#allocation5 + $0xa0] sm:$0xf]  ;;  %v3961_v52 = vld [vmem:[#allocation5 + $0xac] sm:$0xf0] }
 0x154   :  { %1219 = vmatpush.bf16.msra.mxu2 %v2978_v57  ;;  %1232 = vmatpush.bf16.msra.mxu3 %v3106_v58  ;;  %v4029_v57 = vld [vmem:[#allocation5 + $0x2cc] sm:$0xf0]  ;;  %v3238_v58 = vor.u32 %v3961_v52, %v3237_v51  ;;  %v3210_v51 = vor.u32 %v3951_v43, %v3207_v44  ;;  %v4396_v43 = vld [vmem:[%s4553_s4] sm:$0xf] }
 0x156   :  { %1195 = vmatpush.bf16.msra.mxu0 %v2690_v63  ;;  %1208 = vmatpush.bf16.msra.mxu1 %v2818_v1  ;;  %v3989_v63 = vld [vmem:[#allocation5 + $0x18c] sm:$0xf0]  ;;  %v3205_v1 = vld [vmem:[#allocation5 + $0x60] sm:$0xf] }
 0x157   :  { %v3350_v2 = vor.u32 %v3989_v63, %v3349_v62  ;;  %v3943_v63 = vld [vmem:[#allocation5 + $0x24] sm:$0xf] }
 0x158   :  { %1220 = vmatpush.bf16.msra.mxu2 %v2962_v6  ;;  %1233 = vmatpush.bf16.msra.mxu3 %v3090_v7  ;;  %v3206_v6 = vor.u32 %v3953_v3, %v3205_v1  ;;  %v3189_v7 = vld [vmem:[#allocation5 + $0x40] sm:$0xf]  ;;  %v3367_v1 = vld [vmem:[#allocation5 + $0x1b0] sm:$0xf0] }
 0x15a   :  { %1196 = vmatpush.bf16.msra.mxu0 %v2674_v12  ;;  %1209 = vmatpush.bf16.msra.mxu1 %v2802_v13  ;;  %v3173_v12 = vld [vmem:[#allocation5 + $0x20] sm:$0xf]  ;;  %v3945_v13 = vld [vmem:[#allocation5 + $0x2c] sm:$0xf0] }
 0x15b   :  { %v3174_v14 = vor.u32 %v3945_v13, %v3173_v12  ;;  %v4005_v12 = vld [vmem:[#allocation5 + $0x20c] sm:$0xf0]  ;;  %v3653_v13 = vld [vmem:[#allocation5 + $0x3e0] sm:$0xf] }
 0x15c   :  { %1221 = vmatpush.bf16.msra.mxu2 %v2946_v22  ;;  %1234 = vmatpush.bf16.msra.mxu3 %v3074_v23  ;;  %v3274_v22 = vor.u32 %v3967_v18, %v3271_v19  ;;  %v3963_v23 = vld [vmem:[#allocation5 + $0xc4] sm:$0xf]  ;;  %v3335_v18 = vld [vmem:[#allocation5 + $0x170] sm:$0xf0]  ;;  %v3654_v19 = vor.u32 %v4065_v15, %v3653_v13  ;;  %v3277_v15 = vld [vmem:[#allocation5 + $0xe8] sm:$0xf] }
 0x15d   :  { %v3258_v25 = vor.u32 %v3963_v23, %v3255_v24  ;;  %v3527_v23 = vld [vmem:[#allocation5 + $0x2f0] sm:$0xf0] }
 0x15e   :  { %1197 = vmatpush.bf16.msra.mxu0 %v2658_v30  ;;  %1210 = vmatpush.bf16.msra.mxu1 %v2786_v31  ;;  %v3977_v30 = vld [vmem:[#allocation5 + $0x12c] sm:$0xf0]  ;;  %v3493_v31 = vld [vmem:[#allocation5 + $0x2a0] sm:$0xf]  ;;  %v3431_v13 = vld [vmem:[#allocation5 + $0x230] sm:$0xf0] }
 0x15f   :  { %v3302_v32 = vor.u32 %v3977_v30, %v3301_v29  ;;  %v3319_v29 = vld [vmem:[#allocation5 + $0x150] sm:$0xf0]  ;;  %v4027_v30 = vld [vmem:[#allocation5 + $0x2c4] sm:$0xf] }
 0x160   :  { %1222 = vmatpush.bf16.msra.mxu2 %v2930_v36  ;;  %1235 = vmatpush.bf16.msra.mxu3 %v3058_v37  ;;  %v3285_v37 = vld [vmem:[#allocation5 + $0x100] sm:$0xf] }
 0x161   :  { %1198 = vmatmul.bf16.vlgmr.msra.gmra.mxu0 %v4369_v16  ;;  %1211 = vmatmul.bf16.vlgmr.msra.gmra.mxu1 %v4371_v21  ;;  %v3510_v16 = vor.u32 %v4029_v57, %v3509_v56  ;;  %v3222_v21 = vor.u32 %v3957_v61, %v3221_v59  ;;  %v3286_v41 = vor.u32 %v3973_v38, %v3285_v37  ;;  %v3995_v56 = vld [vmem:[#allocation5 + $0x1c4] sm:$0xf]  ;;  %v3383_v57 = vld [vmem:[#allocation5 + $0x1d0] sm:$0xf0]  ;;  %v4013_v61 = vld [vmem:[#allocation5 + $0x24c] sm:$0xf0] }
 0x162   :  { %2028 = vmatpush.bf16.msrb.mxu0 %v3270_v33  ;;  %2041 = vmatpush.bf16.msrb.mxu1 %v3398_v35  ;;  %v4025_v33 = vld [vmem:[#allocation5 + $0x2ac] sm:$0xf0]  ;;  %v3223_v35 = vld [vmem:[#allocation5 + $0x90] sm:$0xf0]  ;;  %v3386_v59 = vor.u32 %v3995_v56, %v3383_v57  ;;  %v3975_v37 = vld [vmem:[#allocation5 + $0x124] sm:$0xf] }
 0x163   :  { %v3494_v36 = vor.u32 %v4025_v33, %v3493_v31  ;;  %v3226_v40 = vor.u32 %v3955_v34, %v3223_v35  ;;  %v3621_v34 = vld [vmem:[#allocation5 + $0x3a0] sm:$0xf]  ;;  %v4057_v35 = vld [vmem:[#allocation5 + $0x3ac] sm:$0xf0]  ;;  %v3303_v38 = vld [vmem:[#allocation5 + $0x130] sm:$0xf0] }
 0x164   :  { %1223 = vmatpush.bf16.msra.mxu2 %v2914_v49  ;;  %1236 = vmatpush.bf16.msra.mxu3 %v3042_v50  ;;  %v3461_v49 = vld [vmem:[#allocation5 + $0x260] sm:$0xf]  ;;  %v4017_v50 = vld [vmem:[#allocation5 + $0x26c] sm:$0xf0]  ;;  %v3306_v0 = vor.u32 %v3975_v37, %v3303_v38 }
 0x165   :  { %v3462_v53 = vor.u32 %v4017_v50, %v3461_v49  ;;  %v3971_v50 = vld [vmem:[#allocation5 + $0x104] sm:$0xf]  ;;  %v3589_v57 = vld [vmem:[#allocation5 + $0x360] sm:$0xf] }
 0x166   :  { %2029 = vmatpush.bf16.msrb.mxu0 %v3254_v45  ;;  %2042 = vmatpush.bf16.msrb.mxu1 %v3382_v48  ;;  %v3999_v45 = vld [vmem:[#allocation5 + $0x1e4] sm:$0xf]  ;;  %v3399_v48 = vld [vmem:[#allocation5 + $0x1f0] sm:$0xf0] }
 0x167   :  { %1224 = vmatmul.bf16.vlgmr.msra.gmra.mxu2 %v4375_v46  ;;  %1237 = vmatmul.bf16.vlgmr.msra.gmra.mxu3 %v4377_v47  ;;  %v3190_v46 = vor.u32 %v3949_v9, %v3189_v7  ;;  %v3318_v47 = vor.u32 %v3981_v11, %v3317_v10  ;;  %v3402_v52 = vor.u32 %v3999_v45, %v3399_v48  ;;  %v3939_v7 = vld [vmem:[#allocation5 + $0x4] sm:$0xf]  ;;  %v3351_v10 = vld [vmem:[#allocation5 + $0x190] sm:$0xf0]  ;;  %v3605_v45 = vld [vmem:[#allocation5 + $0x380] sm:$0xf] }
 0x168   :  { %2054 = vmatpush.bf16.msrb.mxu2 %v3526_v55  ;;  %v3191_v55 = vld [vmem:[#allocation5 + $0x50] sm:$0xf0]  ;;  %v3987_v9 = vld [vmem:[#allocation5 + $0x184] sm:$0xf]  ;;  %2067 = vmatpush.bf16.msrb.mxu3 %v3654_v19  ;;  %v4053_v48 = vld [vmem:[#allocation5 + $0x38c] sm:$0xf0] }
 0x169   :  { %v3606_v49 = vor.u32 %v4053_v48, %v3605_v45 }
 0x16a   :  { %2030 = vmatpush.bf16.msrb.mxu0 %v3238_v58  ;;  %2043 = vmatpush.bf16.msrb.mxu1 %v3366_v60  ;;  %v3194_v58 = vor.u32 %v3947_v54, %v3191_v55  ;;  %v3445_v60 = vld [vmem:[#allocation5 + $0x240] sm:$0xf]  ;;  %v3479_v55 = vld [vmem:[#allocation5 + $0x290] sm:$0xf0] }
 0x16b   :  { %v3446_v62 = vor.u32 %v4013_v61, %v3445_v60  ;;  %v4015_v60 = vld [vmem:[#allocation5 + $0x264] sm:$0xf]  ;;  %v3463_v61 = vld [vmem:[#allocation5 + $0x270] sm:$0xf0] }
 0x16c   :  { %2055 = vmatpush.bf16.msrb.mxu2 %v3510_v16  ;;  %v3175_v16 = vld [vmem:[#allocation5 + $0x30] sm:$0xf0] }
 0x16e   :  { %2031 = vmatpush.bf16.msrb.mxu0 %v3222_v21  ;;  %2044 = vmatpush.bf16.msrb.mxu1 %v3350_v2  ;;  %v3991_v21 = vld [vmem:[#allocation5 + $0x1a4] sm:$0xf]  ;;  %v3178_v2 = vor.u32 %v3943_v63, %v3175_v16 }
 0x16f   :  { %v3370_v3 = vor.u32 %v3991_v21, %v3367_v1  ;;  %v3466_v21 = vor.u32 %v4015_v60, %v3463_v61  ;;  %v3573_v1 = vld [vmem:[#allocation5 + $0x340] sm:$0xf]  ;;  %v3213_v61 = vld [vmem:[#allocation5 + $0x68] sm:$0xf] }
 0x170   :  { %2056 = vmatpush.bf16.msrb.mxu2 %v3494_v36  ;;  %v3622_v36 = vor.u32 %v4057_v35, %v3621_v34  ;;  %v3655_v35 = vld [vmem:[#allocation5 + $0x3f0] sm:$0xf0] }
 0x172   :  { %2032 = vmatpush.bf16.msrb.mxu0 %v3206_v6  ;;  %2045 = vmatpush.bf16.msrb.mxu1 %v3334_v8  ;;  %v3430_v6 = vor.u32 %v4009_v5, %v3429_v4  ;;  %v3159_v8 = vld [vmem:[#allocation5 + $0x10] sm:$0xf0]  ;;  %v4011_v4 = vld [vmem:[#allocation5 + $0x244] sm:$0xf] }
 0x173   :  { %v3162_v11 = vor.u32 %v3939_v7, %v3159_v8  ;;  %v3447_v5 = vld [vmem:[#allocation5 + $0x250] sm:$0xf0] }
 0x174   :  { %2057 = vmatpush.bf16.msrb.mxu2 %v3478_v42  ;;  %v3495_v42 = vld [vmem:[#allocation5 + $0x2b0] sm:$0xf0]  ;;  %v3450_v7 = vor.u32 %v4011_v4, %v3447_v5 }
 0x175   :  { %v3498_v44 = vor.u32 %v4023_v39, %v3495_v42  ;;  %v4059_v42 = vld [vmem:[#allocation5 + $0x3c4] sm:$0xf] }
 0x176   :  { %2033 = vmatpush.bf16.msrb.mxu0 %v3190_v46  ;;  %2046 = vmatpush.bf16.msrb.mxu1 %v3318_v47  ;;  %v3354_v46 = vor.u32 %v3987_v9, %v3351_v10  ;;  %v3413_v47 = vld [vmem:[#allocation5 + $0x200] sm:$0xf] }
 0x178   :  { %2058 = vmatpush.bf16.msrb.mxu2 %v3462_v53  ;;  %v386_v53 = vperm.slane %v4396_v43, 0 }
 0x17a   :  { %2034 = vmatpush.bf16.msrb.mxu0 %v3174_v14  ;;  %2047 = vmatpush.bf16.msrb.mxu1 %v3302_v32  ;;  %v3414_v14 = vor.u32 %v4005_v12, %v3413_v47  ;;  %v3511_v32 = vld [vmem:[#allocation5 + $0x2d0] sm:$0xf0]  ;;  %v4007_v12 = vld [vmem:[#allocation5 + $0x224] sm:$0xf] }
 0x17b   :  { %v3514_v33 = vor.u32 %v4027_v30, %v3511_v32  ;;  %v4063_v30 = vld [vmem:[#allocation5 + $0x3e4] sm:$0xf]  ;;  %v3261_v32 = vld [vmem:[#allocation5 + $0xc8] sm:$0xf] }
 0x17c   :  { %2059 = vmatpush.bf16.msrb.mxu2 %v3446_v62  ;;  %v3658_v38 = vor.u32 %v4063_v30, %v3655_v35  ;;  %v3165_v35 = vld [vmem:[#allocation5 + $0x8] sm:$0xf] }
 0x17e   :  { %2035 = vmatpush.bf16.msrb.mxu0 %v3158_v20  ;;  %2048 = vmatpush.bf16.msrb.mxu1 %v3286_v41  ;;  %v3338_v20 = vor.u32 %v3983_v17, %v3335_v18  ;;  %v3970_v17 = vld [vmem:[#allocation5 + $0xf4] sm:$0xf0]  ;;  %v3434_v18 = vor.u32 %v4007_v12, %v3431_v13  ;;  %v4047_v12 = vld [vmem:[#allocation5 + $0x364] sm:$0xf]  ;;  %v3591_v13 = vld [vmem:[#allocation5 + $0x370] sm:$0xf0] }
 0x180   :  { %2060 = vmatpush.bf16.msrb.mxu2 %v3430_v6 }
 0x182   :  { %2080 = vmatpush.bf16.msra.mxu0 %v3274_v22  ;;  %2093 = vmatpush.bf16.msra.mxu1 %v3402_v52  ;;  %v4031_v22 = vld [vmem:[#allocation5 + $0x2e4] sm:$0xf] }
 0x183   :  { %v3530_v24 = vor.u32 %v4031_v22, %v3527_v23  ;;  %v4019_v52 = vld [vmem:[#allocation5 + $0x284] sm:$0xf]  ;;  %v387_v23 = vperm.slane %v4396_v43, 1 }
 0x184   :  { %2061 = vmatpush.bf16.msrb.mxu2 %v3414_v14  ;;  %v3482_v56 = vor.u32 %v4019_v52, %v3479_v55  ;;  %v3623_v55 = vld [vmem:[#allocation5 + $0x3b0] sm:$0xf0] }
 0x186   :  { %2081 = vmatpush.bf16.msra.mxu0 %v3258_v25  ;;  %2094 = vmatpush.bf16.msra.mxu1 %v3386_v59  ;;  %v3637_v25 = vld [vmem:[#allocation5 + $0x3c0] sm:$0xf] }
 0x187   :  { %v3638_v27 = vor.u32 %v4061_v26, %v3637_v25  ;;  %v4037_v25 = vld [vmem:[#allocation5 + $0x30c] sm:$0xf0]  ;;  %v3278_v26 = vor.u32 %v3970_v17, %v3277_v15 }
 0x188   :  { %2106 = vmatpush.bf16.msra.mxu2 %v3530_v24  ;;  %v3541_v24 = vld [vmem:[#allocation5 + $0x300] sm:$0xf] }
 0x189   :  { %2068 = vmatpush.bf16.msrb.mxu3 %v3638_v27  ;;  %v3542_v27 = vor.u32 %v4037_v25, %v3541_v24  ;;  %v3373_v24 = vld [vmem:[#allocation5 + $0x1a8] sm:$0xf]  ;;  %v3994_v25 = vld [vmem:[#allocation5 + $0x1b4] sm:$0xf0] }
 0x18a   :  { %2082 = vmatpush.bf16.msra.mxu0 %v3242_v28  ;;  %2095 = vmatpush.bf16.msra.mxu1 %v3370_v3  ;;  %v3979_v28 = vld [vmem:[#allocation5 + $0x144] sm:$0xf] }
 0x18b   :  { %v3322_v31 = vor.u32 %v3979_v28, %v3319_v29  ;;  %v4003_v28 = vld [vmem:[#allocation5 + $0x204] sm:$0xf]  ;;  %v3415_v29 = vld [vmem:[#allocation5 + $0x210] sm:$0xf0] }
 0x18c   :  { %2107 = vmatpush.bf16.msra.mxu2 %v3514_v33  ;;  %v3966_v33 = vld [vmem:[#allocation5 + $0xd4] sm:$0xf0]  ;;  %v3418_v34 = vor.u32 %v4003_v28, %v3415_v29 }
 0x18d   :  { %2069 = vmatpush.bf16.msrb.mxu3 %v3622_v36  ;;  %v3262_v39 = vor.u32 %v3966_v33, %v3261_v32 }
 0x18e   :  { %2083 = vmatpush.bf16.msra.mxu0 %v3226_v40  ;;  %2096 = vmatpush.bf16.msra.mxu1 %v3354_v46  ;;  %v4041_v46 = vld [vmem:[#allocation5 + $0x32c] sm:$0xf0] }
 0x190   :  { %2108 = vmatpush.bf16.msra.mxu2 %v3498_v44  ;;  %v3639_v44 = vld [vmem:[#allocation5 + $0x3d0] sm:$0xf0] }
 0x191   :  { %2070 = vmatpush.bf16.msrb.mxu3 %v3606_v49  ;;  %v3642_v49 = vor.u32 %v4059_v42, %v3639_v44  ;;  %v3279_v42 = vld [vmem:[#allocation5 + $0xf8] sm:$0xf0] }
 0x192   :  { %2084 = vmatpush.bf16.msra.mxu0 %v3210_v51  ;;  %2097 = vmatpush.bf16.msra.mxu1 %v3338_v20  ;;  %v3287_v51 = vld [vmem:[#allocation5 + $0x110] sm:$0xf0] }
 0x193   :  { %v3290_v54 = vor.u32 %v3971_v50, %v3287_v51  ;;  %v3229_v51 = vld [vmem:[#allocation5 + $0x88] sm:$0xf] }
 0x194   :  { %2109 = vmatpush.bf16.msra.mxu2 %v3482_v56 }
 0x196   :  { %2085 = vmatpush.bf16.msra.mxu0 %v3194_v58  ;;  %2098 = vmatpush.bf16.msra.mxu1 %v3322_v31  ;;  %v4049_v58 = vld [vmem:[#allocation5 + $0x36c] sm:$0xf0] }
 0x197   :  { %v3590_v59 = vor.u32 %v4049_v58, %v3589_v57 }
 0x198   :  { %2110 = vmatpush.bf16.msra.mxu2 %v3466_v21  ;;  %v4002_v21 = vld [vmem:[#allocation5 + $0x1f4] sm:$0xf0] }
 0x199   :  { %2071 = vmatpush.bf16.msrb.mxu3 %v3590_v59 }
 0x19a   :  { %2086 = vmatpush.bf16.msra.mxu0 %v3178_v2  ;;  %2099 = vmatpush.bf16.msra.mxu1 %v3306_v0  ;;  %v4045_v2 = vld [vmem:[#allocation5 + $0x34c] sm:$0xf0]  ;;  %v3962_v0 = vld [vmem:[#allocation5 + $0xb4] sm:$0xf0] }
 0x19b   :  { %v3574_v3 = vor.u32 %v4045_v2, %v3573_v1  ;;  %v4051_v1 = vld [vmem:[#allocation5 + $0x384] sm:$0xf]  ;;  %v3607_v2 = vld [vmem:[#allocation5 + $0x390] sm:$0xf0] }
 0x19c   :  { %2111 = vmatpush.bf16.msra.mxu2 %v3450_v7  ;;  %v3610_v5 = vor.u32 %v4051_v1, %v3607_v2  ;;  %v3325_v2 = vld [vmem:[#allocation5 + $0x148] sm:$0xf] }
 0x19d   :  { %v1043_v40 = vpop.f32.mrf.mxu0  ;;  %v1056_v41 = vpop.f32.mrf.mxu1  ;;  %2072 = vmatpush.bf16.msrb.mxu3 %v3574_v3 }
 0x19e   :  { %2087 = vmatpush.bf16.msra.mxu0 %v3162_v11  ;;  %2100 = vmatpush.bf16.msra.mxu1 %v3290_v54  ;;  %v1044_v62 = vadd.f32 %v1043_v40, %v386_v53  ;;  %v3557_v11 = vld [vmem:[#allocation5 + $0x320] sm:$0xf]  ;;  %v3245_v40 = vld [vmem:[#allocation5 + $0xa8] sm:$0xf]  ;;  %v3958_v53 = vld [vmem:[#allocation5 + $0x94] sm:$0xf0] }
 0x19f   :  { %v3558_v47 = vor.u32 %v4041_v46, %v3557_v11  ;;  %v3246_v50 = vor.u32 %v3962_v0, %v3245_v40  ;;  %v4055_v54 = vld [vmem:[#allocation5 + $0x3a4] sm:$0xf]  ;;  %v3230_v60 = vor.u32 %v3958_v53, %v3229_v51  ;;  %v3389_v11 = vld [vmem:[#allocation5 + $0x1c8] sm:$0xf]  ;;  %v3559_v40 = vld [vmem:[#allocation5 + $0x330] sm:$0xf0] }
 0x1a0   :  { %v1057_v6 = vadd.f32 %v1056_v41, %v1044_v62  ;;  %2112 = vmatpush.bf16.msra.mxu2 %v3434_v18  ;;  %v3626_v58 = vor.u32 %v4055_v54, %v3623_v55  ;;  %v3954_v62 = vld [vmem:[#allocation5 + $0x74] sm:$0xf0]  ;;  %v3594_v18 = vor.u32 %v4047_v12, %v3591_v13  ;;  %v3968_v0 = vld [vmem:[#allocation5 + $0xec] sm:$0xf]  ;;  %v3533_v55 = vld [vmem:[#allocation5 + $0x2e8] sm:$0xf] }
 0x1a1   :  { %2073 = vmatpush.bf16.msrb.mxu3 %v3558_v47  ;;  %v3214_v7 = vor.u32 %v3954_v62, %v3213_v61  ;;  %v3998_v47 = vld [vmem:[#allocation5 + $0x1d4] sm:$0xf0]  ;;  %v3282_v54 = vor.u32 %v3968_v0, %v3279_v42  ;;  %v3263_v61 = vld [vmem:[#allocation5 + $0xd8] sm:$0xf0]  ;;  %v3309_v13 = vld [vmem:[#allocation5 + $0x128] sm:$0xf] }
 0x1a2   :  { %v3986_v53 = vld [vmem:[#allocation5 + $0x174] sm:$0xf0]  ;;  %v3948_v0 = vld [vmem:[#allocation5 + $0x4c] sm:$0xf]  ;;  %v3199_v42 = vld [vmem:[#allocation5 + $0x58] sm:$0xf0] }
 0x1a4   :  { %2113 = vmatpush.bf16.msra.mxu2 %v3418_v34  ;;  %v3374_v34 = vor.u32 %v3994_v25, %v3373_v24  ;;  %v3293_v24 = vld [vmem:[#allocation5 + $0x108] sm:$0xf]  ;;  %v3974_v25 = vld [vmem:[#allocation5 + $0x114] sm:$0xf0] }
 0x1a5   :  { %v1045_v63 = vpop.f32.mrf.mxu0  ;;  %v1058_v16 = vpop.f32.mrf.mxu1  ;;  %2074 = vmatpush.bf16.msrb.mxu3 %v3542_v27  ;;  %v3575_v27 = vld [vmem:[#allocation5 + $0x350] sm:$0xf0] }
 0x1a6   :  { %v3405_v63 = vld [vmem:[#allocation5 + $0x1e8] sm:$0xf] }
 0x1a9   :  { %2119 = vmatpush.bf16.msra.mxu3 %v3658_v38  ;;  %v3990_v38 = vld [vmem:[#allocation5 + $0x194] sm:$0xf0] }
 0x1aa   :  { %v1069_v8 = vpop.f32.mrf.mxu2  ;;  %v1082_v9 = vpop.f32.mrf.mxu3 }
 0x1ab   :  { %v1070_v10 = vadd.f32 %v1069_v8, %v1057_v6  ;;  %v3406_v8 = vor.u32 %v4002_v21, %v3405_v63 }
 0x1ad   :  { %v1083_v14 = vadd.f32 %v1082_v9, %v1070_v10  ;;  %2120 = vmatpush.bf16.msra.mxu3 %v3642_v49  ;;  %v3197_v9 = vld [vmem:[#allocation5 + $0x48] sm:$0xf]  ;;  %v3950_v10 = vld [vmem:[#allocation5 + $0x54] sm:$0xf0] }
 0x1ae   :  { %v1095_v19 = vpop.f32.mrf.mxu0  ;;  %v1108_v20 = vpop.f32.mrf.mxu1 }
 0x1af   :  { %v1242_v22 = vmax.f32 %v1083_v14, 0.0  ;;  %v1096_v41 = vadd.f32 %v1095_v19, %v387_v23  ;;  %v388_v14 = vperm.slane %v4396_v43, 2  ;;  %v3198_v19 = vor.u32 %v3950_v10, %v3197_v9  ;;  %v3946_v23 = vld [vmem:[#allocation5 + $0x34] sm:$0xf0] }
 0x1b1   :  { %v4400_v31 = vpack.c.bf16 %v1242_v22, %v1242_v22  ;;  %v1109_v52 = vadd.f32 %v1108_v20, %v1096_v41  ;;  %2121 = vmatpush.bf16.msra.mxu3 %v3626_v58  ;;  %v3390_v20 = vor.u32 %v3998_v47, %v3389_v11  ;;  %v3181_v22 = vld [vmem:[#allocation5 + $0x28] sm:$0xf] }
 0x1b2   :  { %v1071_v36 = vpop.f32.mrf.mxu2  ;;  %v1084_v37 = vpop.f32.mrf.mxu3  ;;  %v3182_v33 = vor.u32 %v3946_v23, %v3181_v22 }
 0x1b3   :  { %2036 = vmatmul.bf16.vlgmr.msrb.gmra.mxu0 %v4400_v31  ;;  %v3942_v36 = vld [vmem:[#allocation5 + $0x14] sm:$0xf0]  ;;  %v3357_v37 = vld [vmem:[#allocation5 + $0x188] sm:$0xf] }
 0x1b4   :  { %2132 = vmatpush.bf16.msrb.mxu0 %v3278_v26  ;;  %v4043_v26 = vld [vmem:[#allocation5 + $0x344] sm:$0xf]  ;;  %v3358_v51 = vor.u32 %v3990_v38, %v3357_v37 }
 0x1b5   :  { %2122 = vmatpush.bf16.msra.mxu3 %v3610_v5  ;;  %v3578_v32 = vor.u32 %v4043_v26, %v3575_v27  ;;  %v3485_v26 = vld [vmem:[#allocation5 + $0x288] sm:$0xf]  ;;  %v4022_v27 = vld [vmem:[#allocation5 + $0x294] sm:$0xf0] }
 0x1b6   :  { %v1097_v45 = vpop.f32.mrf.mxu0  ;;  %v1110_v48 = vpop.f32.mrf.mxu1  ;;  %v3486_v37 = vor.u32 %v4022_v27, %v3485_v26  ;;  %v3645_v27 = vld [vmem:[#allocation5 + $0x3c8] sm:$0xf] }
 0x1b8   :  { %2133 = vmatpush.bf16.msrb.mxu0 %v3262_v39  ;;  %v4039_v39 = vld [vmem:[#allocation5 + $0x324] sm:$0xf] }
 0x1b9   :  { %2123 = vmatpush.bf16.msra.mxu3 %v3594_v18  ;;  %v3562_v44 = vor.u32 %v4039_v39, %v3559_v40  ;;  %v3956_v18 = vld [vmem:[#allocation5 + $0x8c] sm:$0xf]  ;;  %v3469_v39 = vld [vmem:[#allocation5 + $0x268] sm:$0xf] }
 0x1ba   :  { %v1121_v56 = vpop.f32.mrf.mxu2  ;;  %v1134_v57 = vpop.f32.mrf.mxu3 }
 0x1bb   :  { %v1122_v59 = vadd.f32 %v1121_v56, %v1109_v52  ;;  %v3341_v52 = vld [vmem:[#allocation5 + $0x168] sm:$0xf]  ;;  %v4035_v56 = vld [vmem:[#allocation5 + $0x304] sm:$0xf] }
 0x1bc   :  { %2134 = vmatpush.bf16.msrb.mxu0 %v3246_v50  ;;  %v3166_v50 = vor.u32 %v3942_v36, %v3165_v35  ;;  %v3294_v35 = vor.u32 %v3974_v25, %v3293_v24  ;;  %v389_v36 = vperm.slane %v4396_v43, 3 }
 0x1bd   :  { %v1135_v16 = vadd.f32 %v1134_v57, %v1122_v59  ;;  %2124 = vmatpush.bf16.msra.mxu3 %v3578_v32  ;;  %v3543_v57 = vld [vmem:[#allocation5 + $0x310] sm:$0xf0]  ;;  %v4034_v59 = vld [vmem:[#allocation5 + $0x2f4] sm:$0xf0] }
 0x1be   :  { %v1147_v3 = vpop.f32.mrf.mxu0  ;;  %v1160_v4 = vpop.f32.mrf.mxu1  ;;  %v3546_v62 = vor.u32 %v4035_v56, %v3543_v57  ;;  %v3534_v21 = vor.u32 %v4034_v59, %v3533_v55  ;;  %v3992_v57 = vld [vmem:[#allocation5 + $0x1ac] sm:$0xf] }
 0x1bf   :  { %v1243_v6 = vmax.f32 %v1135_v16, 0.0  ;;  %v1148_v28 = vadd.f32 %v1147_v3, %v388_v14  ;;  %v3342_v16 = vor.u32 %v3986_v53, %v3341_v52  ;;  %v3982_v3 = vld [vmem:[#allocation5 + $0x154] sm:$0xf0]  ;;  %v3944_v53 = vld [vmem:[#allocation5 + $0x2c] sm:$0xf] }
 0x1c0   :  { %2135 = vmatpush.bf16.msrb.mxu0 %v3230_v60  ;;  %v3964_v60 = vld [vmem:[#allocation5 + $0xcc] sm:$0xf]  ;;  %v3326_v11 = vor.u32 %v3982_v3, %v3325_v2  ;;  %v3978_v14 = vld [vmem:[#allocation5 + $0x134] sm:$0xf0] }
 0x1c1   :  { %v4403_v46 = vpack.c.bf16 %v1243_v6, %v1243_v6  ;;  %v1161_v41 = vadd.f32 %v1160_v4, %v1148_v28  ;;  %2125 = vmatpush.bf16.msra.mxu3 %v3562_v44  ;;  %v3266_v1 = vor.u32 %v3964_v60, %v3263_v61  ;;  %v3517_v4 = vld [vmem:[#allocation5 + $0x2c8] sm:$0xf]  ;;  %v4030_v6 = vld [vmem:[#allocation5 + $0x2d4] sm:$0xf0]  ;;  %v3952_v28 = vld [vmem:[#allocation5 + $0x6c] sm:$0xf] }
 0x1c2   :  { %v1123_v15 = vpop.f32.mrf.mxu2  ;;  %v1136_v17 = vpop.f32.mrf.mxu3  ;;  %v3518_v47 = vor.u32 %v4030_v6, %v3517_v4  ;;  %v3996_v44 = vld [vmem:[#allocation5 + $0x1cc] sm:$0xf]  ;;  %v4014_v52 = vld [vmem:[#allocation5 + $0x254] sm:$0xf0]  ;;  %v3437_v61 = vld [vmem:[#allocation5 + $0x228] sm:$0xf] }
 0x1c3   :  { %2049 = vmatmul.bf16.vlgmr.msrb.gmra.mxu1 %v4403_v46  ;;  %2088 = vmatmul.bf16.vlgmr.msra.gmra.mxu0 %v4400_v31  ;;  %v3501_v15 = vld [vmem:[#allocation5 + $0x2a8] sm:$0xf]  ;;  %v4026_v17 = vld [vmem:[#allocation5 + $0x2b4] sm:$0xf0]  ;;  %v3988_v4 = vld [vmem:[#allocation5 + $0x18c] sm:$0xf] }
 0x1c4   :  { %2136 = vmatpush.bf16.msrb.mxu0 %v3214_v7  ;;  %2145 = vmatpush.bf16.msrb.mxu1 %v3406_v8  ;;  %v3960_v7 = vld [vmem:[#allocation5 + $0xac] sm:$0xf]  ;;  %v3247_v8 = vld [vmem:[#allocation5 + $0xb8] sm:$0xf0]  ;;  %v3502_v22 = vor.u32 %v4026_v17, %v3501_v15 }
 0x1c5   :  { %2126 = vmatpush.bf16.msra.mxu3 %v3546_v62  ;;  %v3250_v12 = vor.u32 %v3960_v7, %v3247_v8  ;;  %v3359_v6 = vld [vmem:[#allocation5 + $0x198] sm:$0xf0]  ;;  %v3984_v15 = vld [vmem:[#allocation5 + $0x16c] sm:$0xf] }
 0x1c6   :  { %v1149_v29 = vpop.f32.mrf.mxu0  ;;  %v1162_v30 = vpop.f32.mrf.mxu1  ;;  %v3343_v17 = vld [vmem:[#allocation5 + $0x178] sm:$0xf0] }
 0x1c7   :  { %v3215_v29 = vld [vmem:[#allocation5 + $0x78] sm:$0xf0]  ;;  %v3346_v25 = vor.u32 %v3984_v15, %v3343_v17 }
 0x1c8   :  { %2137 = vmatpush.bf16.msrb.mxu0 %v3198_v19  ;;  %2146 = vmatpush.bf16.msrb.mxu1 %v3390_v20  ;;  %v3231_v19 = vld [vmem:[#allocation5 + $0x98] sm:$0xf0]  ;;  %v3310_v20 = vor.u32 %v3978_v14, %v3309_v13  ;;  %v3218_v38 = vor.u32 %v3952_v28, %v3215_v29  ;;  %v3661_v13 = vld [vmem:[#allocation5 + $0x3e8] sm:$0xf]  ;;  %v4066_v14 = vld [vmem:[#allocation5 + $0x3f4] sm:$0xf0] }
 0x1c9   :  { %v3234_v23 = vor.u32 %v3956_v18, %v3231_v19  ;;  %v4032_v18 = vld [vmem:[#allocation5 + $0x2ec] sm:$0xf]  ;;  %v3535_v19 = vld [vmem:[#allocation5 + $0x2f8] sm:$0xf0]  ;;  %v4062_v28 = vld [vmem:[#allocation5 + $0x3d4] sm:$0xf0] }
 0x1ca   :  { %v1173_v45 = vpop.f32.mrf.mxu2  ;;  %v1186_v48 = vpop.f32.mrf.mxu3  ;;  %v3538_v26 = vor.u32 %v4032_v18, %v3535_v19  ;;  %v3980_v29 = vld [vmem:[#allocation5 + $0x14c] sm:$0xf]  ;;  %v3663_v15 = vld [vmem:[#allocation5 + $0x3f8] sm:$0xf0] }
 0x1cb   :  { %v1174_v49 = vadd.f32 %v1173_v45, %v1161_v41  ;;  %v4018_v41 = vld [vmem:[#allocation5 + $0x274] sm:$0xf0]  ;;  %v3391_v45 = vld [vmem:[#allocation5 + $0x1d8] sm:$0xf0]  ;;  %v4060_v19 = vld [vmem:[#allocation5 + $0x3cc] sm:$0xf] }
 0x1cc   :  { %2138 = vmatpush.bf16.msrb.mxu0 %v3182_v33  ;;  %2147 = vmatpush.bf16.msrb.mxu1 %v3374_v34  ;;  %v4000_v33 = vld [vmem:[#allocation5 + $0x1ec] sm:$0xf]  ;;  %v3407_v34 = vld [vmem:[#allocation5 + $0x1f8] sm:$0xf0]  ;;  %v3394_v43 = vor.u32 %v3996_v44, %v3391_v45 }
 0x1cd   :  { %v1187_v58 = vadd.f32 %v1186_v48, %v1174_v49  ;;  %v3410_v40 = vor.u32 %v4000_v33, %v3407_v34  ;;  %v3470_v48 = vor.u32 %v4018_v41, %v3469_v39  ;;  %v3202_v49 = vor.u32 %v3948_v0, %v3199_v42  ;;  %v3327_v33 = vld [vmem:[#allocation5 + $0x158] sm:$0xf0]  ;;  %v4028_v34 = vld [vmem:[#allocation5 + $0x2cc] sm:$0xf]  ;;  %v3629_v39 = vld [vmem:[#allocation5 + $0x3a8] sm:$0xf] }
 0x1ce   :  { %v3976_v41 = vld [vmem:[#allocation5 + $0x12c] sm:$0xf]  ;;  %v3311_v0 = vld [vmem:[#allocation5 + $0x138] sm:$0xf0] }
 0x1cf   :  { %v1244_v63 = vmax.f32 %v1187_v58, 0.0  ;;  %v3375_v58 = vld [vmem:[#allocation5 + $0x1b8] sm:$0xf0]  ;;  %v4024_v42 = vld [vmem:[#allocation5 + $0x2ac] sm:$0xf] }
 0x1d0   :  { %2139 = vmatpush.bf16.msrb.mxu0 %v3166_v50  ;;  %2148 = vmatpush.bf16.msrb.mxu1 %v3358_v51  ;;  %v3453_v50 = vld [vmem:[#allocation5 + $0x248] sm:$0xf]  ;;  %v3503_v44 = vld [vmem:[#allocation5 + $0x2b8] sm:$0xf0] }
 0x1d1   :  { %v4408_v5 = vpack.c.bf16 %v1244_v63, %v1244_v63  ;;  %v3454_v59 = vor.u32 %v4014_v52, %v3453_v50  ;;  %v3378_v63 = vor.u32 %v3992_v57, %v3375_v58  ;;  %v4054_v50 = vld [vmem:[#allocation5 + $0x394] sm:$0xf0]  ;;  %v4020_v52 = vld [vmem:[#allocation5 + $0x28c] sm:$0xf]  ;;  %v3597_v57 = vld [vmem:[#allocation5 + $0x368] sm:$0xf] }
 0x1d2   :  { %v1175_v9 = vpop.f32.mrf.mxu2  ;;  %v1188_v10 = vpop.f32.mrf.mxu3  ;;  %v4050_v58 = vld [vmem:[#allocation5 + $0x374] sm:$0xf0] }
 0x1d3   :  { %2101 = vmatmul.bf16.vlgmr.msra.gmra.mxu1 %v4403_v46  ;;  %2140 = vmatmul.bf16.vlgmr.msrb.gmra.mxu0 %v4400_v31  ;;  %v3421_v10 = vld [vmem:[#allocation5 + $0x208] sm:$0xf] }
 0x1d4   :  { %2184 = vmatpush.bf16.msra.mxu0 %v3282_v54  ;;  %2062 = vmatmul.bf16.vlgmr.msrb.gmra.mxu2 %v4408_v5  ;;  %v3183_v54 = vld [vmem:[#allocation5 + $0x38] sm:$0xf0] }
 0x1d5   :  { %2149 = vmatpush.bf16.msrb.mxu1 %v3342_v16  ;;  %2158 = vmatpush.bf16.msrb.mxu2 %v3534_v21  ;;  %v3186_v60 = vor.u32 %v3944_v53, %v3183_v54  ;;  %v4010_v16 = vld [vmem:[#allocation5 + $0x234] sm:$0xf0]  ;;  %v3940_v21 = vld [vmem:[#allocation5 + $0xc] sm:$0xf]  ;;  %v3487_v53 = vld [vmem:[#allocation5 + $0x298] sm:$0xf0] }
 0x1d6   :  { %v3438_v8 = vor.u32 %v4010_v16, %v3437_v61  ;;  %v3598_v61 = vor.u32 %v4050_v58, %v3597_v57  ;;  %v4046_v16 = vld [vmem:[#allocation5 + $0x354] sm:$0xf0]  ;;  %v4068_v57 = vld [vmem:[%s4556_s7 + $0x8] sm:$0xff] }
 0x1d7   :  { %v4080_v58 = vld [vmem:[%s4556_s7 + $0x68] sm:$0xff] }
 0x1d8   :  { %2185 = vmatpush.bf16.msra.mxu0 %v3266_v1  ;;  %v3167_v1 = vld [vmem:[#allocation5 + $0x18] sm:$0xf0] }
 0x1d9   :  { %2150 = vmatpush.bf16.msrb.mxu1 %v3326_v11  ;;  %2159 = vmatpush.bf16.msrb.mxu2 %v3518_v47  ;;  %v3170_v9 = vor.u32 %v3940_v21, %v3167_v1  ;;  %v4006_v11 = vld [vmem:[#allocation5 + $0x214] sm:$0xf0]  ;;  %v4012_v21 = vld [vmem:[#allocation5 + $0x24c] sm:$0xf]  ;;  %v3455_v1 = vld [vmem:[#allocation5 + $0x258] sm:$0xf0] }
 0x1dc   :  { %2186 = vmatpush.bf16.msra.mxu0 %v3250_v12  ;;  %v3362_v12 = vor.u32 %v3988_v4, %v3359_v6  ;;  %v3565_v4 = vld [vmem:[#allocation5 + $0x328] sm:$0xf]  ;;  %v4042_v6 = vld [vmem:[#allocation5 + $0x334] sm:$0xf0] }
 0x1dd   :  { %2151 = vmatpush.bf16.msrb.mxu1 %v3310_v20  ;;  %2160 = vmatpush.bf16.msrb.mxu2 %v3502_v22  ;;  %v3422_v22 = vor.u32 %v4006_v11, %v3421_v10  ;;  %v3549_v11 = vld [vmem:[#allocation5 + $0x308] sm:$0xf] }
 0x1de   :  { %v1199_v30 = vpop.f32.mrf.mxu0  ;;  %v1212_v32 = vpop.f32.mrf.mxu1 }
 0x1df   :  { %v1200_v51 = vadd.f32 %v1199_v30, %v389_v36  ;;  %v3646_v36 = vor.u32 %v4062_v28, %v3645_v27  ;;  %v4052_v27 = vld [vmem:[#allocation5 + $0x38c] sm:$0xf]  ;;  %v3615_v28 = vld [vmem:[#allocation5 + $0x398] sm:$0xf0] }
 0x1e0   :  { %2187 = vmatpush.bf16.msra.mxu0 %v3234_v23  ;;  %v3662_v23 = vor.u32 %v4066_v14, %v3661_v13  ;;  %v3423_v13 = vld [vmem:[#allocation5 + $0x218] sm:$0xf0]  ;;  %v4064_v14 = vld [vmem:[#allocation5 + $0x3ec] sm:$0xf] }
 0x1e1   :  { %2152 = vmatpush.bf16.msrb.mxu1 %v3294_v35  ;;  %2161 = vmatpush.bf16.msrb.mxu2 %v3486_v37  ;;  %v1213_v62 = vadd.f32 %v1212_v32, %v1200_v51  ;;  %v3519_v35 = vld [vmem:[#allocation5 + $0x2d8] sm:$0xf0]  ;;  %v3330_v37 = vor.u32 %v3980_v29, %v3327_v33  ;;  %v3972_v51 = vld [vmem:[#allocation5 + $0x10c] sm:$0xf]  ;;  %v3666_v18 = vor.u32 %v4064_v14, %v3663_v15  ;;  %v4085_v14 = vld [vmem:[%s4556_s7 + $0x90] sm:$0xff] }
 0x1e2   :  { %v3618_v29 = vor.u32 %v4052_v27, %v3615_v28  ;;  %v4083_v27 = vld [vmem:[%s4556_s7 + $0x80] sm:$0xff]  ;;  %v4098_v28 = vld [vmem:[%s4556_s7 + $0xf8] sm:$0xff] }
 0x1e4   :  { %2188 = vmatpush.bf16.msra.mxu0 %v3218_v38  ;;  %2153 = vmatmul.bf16.vlgmr.msrb.gmra.mxu1 %v4403_v46  ;;  %v3522_v38 = vor.u32 %v4028_v34, %v3519_v35  ;;  %v4044_v34 = vld [vmem:[#allocation5 + $0x34c] sm:$0xf]  ;;  %v3583_v35 = vld [vmem:[#allocation5 + $0x358] sm:$0xf0] }
 0x1e5   :  { %2197 = vmatpush.bf16.msra.mxu1 %v3410_v40  ;;  %2114 = vmatmul.bf16.vlgmr.msra.gmra.mxu2 %v4408_v5  ;;  %v4058_v40 = vld [vmem:[#allocation5 + $0x3b4] sm:$0xf0] }
 0x1e6   :  { %v1201_v55 = vpop.f32.mrf.mxu0  ;;  %v1214_v56 = vpop.f32.mrf.mxu1  ;;  %2162 = vmatpush.bf16.msrb.mxu2 %v3470_v48  ;;  %v3630_v45 = vor.u32 %v4058_v40, %v3629_v39  ;;  %v3506_v48 = vor.u32 %v4024_v42, %v3503_v44  ;;  %v4036_v40 = vld [vmem:[#allocation5 + $0x30c] sm:$0xf]  ;;  %v4074_v44 = vld [vmem:[%s4556_s7 + $0x38] sm:$0xff] }
 0x1e7   :  { %v3490_v56 = vor.u32 %v4020_v52, %v3487_v53  ;;  %v4082_v52 = vld [vmem:[%s4556_s7 + $0x78] sm:$0xff]  ;;  %v4069_v53 = vld [vmem:[%s4556_s7 + $0x10] sm:$0xff] }
 0x1e8   :  { %2189 = vmatpush.bf16.msra.mxu0 %v3202_v49  ;;  %v3613_v49 = vld [vmem:[#allocation5 + $0x388] sm:$0xf] }
 0x1e9   :  { %2198 = vmatpush.bf16.msra.mxu1 %v3394_v43  ;;  %v3295_v43 = vld [vmem:[#allocation5 + $0x118] sm:$0xf0]  ;;  %v3614_v54 = vor.u32 %v4054_v50, %v3613_v49  ;;  %v4072_v49 = vld [vmem:[%s4556_s7 + $0x28] sm:$0xff] }
 0x1ea   :  { %v1225_v2 = vpop.f32.mrf.mxu2  ;;  %v1238_v3 = vpop.f32.mrf.mxu3  ;;  %2163 = vmatpush.bf16.msrb.mxu2 %v3454_v59  ;;  %v3298_v55 = vor.u32 %v3972_v51, %v3295_v43  ;;  %v4016_v59 = vld [vmem:[#allocation5 + $0x26c] sm:$0xf]  ;;  %v4070_v43 = vld [vmem:[%s4556_s7 + $0x18] sm:$0xff] }
 0x1eb   :  { %v1226_v7 = vadd.f32 %v1225_v2, %v1213_v62 }
 0x1ec   :  { %2190 = vmatpush.bf16.msra.mxu0 %v3186_v60  ;;  %v3471_v60 = vld [vmem:[#allocation5 + $0x278] sm:$0xf0] }
 0x1ed   :  { %v1239_v47 = vadd.f32 %v1238_v3, %v1226_v7  ;;  %2199 = vmatpush.bf16.msra.mxu1 %v3378_v63  ;;  %v3474_v62 = vor.u32 %v4016_v59, %v3471_v60  ;;  %v3581_v63 = vld [vmem:[#allocation5 + $0x348] sm:$0xf]  ;;  %v3458_v3 = vor.u32 %v4012_v21, %v3455_v1  ;;  %v4008_v7 = vld [vmem:[#allocation5 + $0x22c] sm:$0xf]  ;;  %v4067_v59 = vld [vmem:[%s4556_s7] sm:$0xff] }
 0x1ee   :  { %2164 = vmatpush.bf16.msrb.mxu2 %v3438_v8  ;;  %v3582_v2 = vor.u32 %v4046_v16, %v3581_v63  ;;  %v3439_v8 = vld [vmem:[#allocation5 + $0x238] sm:$0xf0]  ;;  %v4079_v60 = vld [vmem:[%s4556_s7 + $0x60] sm:$0xff]  ;;  %v4077_v1 = vld [vmem:[%s4556_s7 + $0x50] sm:$0xff] }
 0x1ef   :  { %v1245_v20 = vmax.f32 %v1239_v47, 0.0  ;;  %v3442_v10 = vor.u32 %v4008_v7, %v3439_v8  ;;  %v4038_v47 = vld [vmem:[#allocation5 + $0x314] sm:$0xf0]  ;;  %v4088_v7 = vld [vmem:[%s4556_s7 + $0xa8] sm:$0xff]  ;;  %v4075_v8 = vld [vmem:[%s4556_s7 + $0x40] sm:$0xff] }
 0x1f0   :  { %2191 = vmatpush.bf16.msra.mxu0 %v3170_v9  ;;  %v3566_v9 = vor.u32 %v4042_v6, %v3565_v4  ;;  %v3550_v17 = vor.u32 %v4038_v47, %v3549_v11  ;;  %v4078_v16 = vld [vmem:[%s4556_s7 + $0x58] sm:$0xff]  ;;  %v4076_v6 = vld [vmem:[%s4556_s7 + $0x48] sm:$0xff] }
 0x1f1   :  { %v4416_v24 = vpack.c.bf16 %v1245_v20, %v1245_v20  ;;  %2200 = vmatpush.bf16.msra.mxu1 %v3362_v12  ;;  %v4004_v12 = vld [vmem:[#allocation5 + $0x20c] sm:$0xf]  ;;  %v3647_v20 = vld [vmem:[#allocation5 + $0x3d8] sm:$0xf0] }
 0x1f2   :  { %v1227_v30 = vpop.f32.mrf.mxu2  ;;  %v1240_v32 = vpop.f32.mrf.mxu3  ;;  %2165 = vmatpush.bf16.msrb.mxu2 %v3422_v22  ;;  %v3650_v22 = vor.u32 %v4060_v19, %v3647_v20  ;;  %v4090_v21 = vld [vmem:[%s4556_s7 + $0xb8] sm:$0xff]  ;;  %v4084_v20 = vld [vmem:[%s4556_s7 + $0x88] sm:$0xff] }
 0x1f3   :  { %2075 = vmatmul.bf16.vlgmr.msrb.gmra.mxu3 %v4416_v24  ;;  %2192 = vmatmul.bf16.vlgmr.msra.gmra.mxu0 %v4400_v31  ;;  %v3314_v31 = vor.u32 %v3976_v41, %v3311_v0  ;;  %v4048_v30 = vld [vmem:[#allocation5 + $0x36c] sm:$0xf]  ;;  %v3599_v32 = vld [vmem:[#allocation5 + $0x378] sm:$0xf0] }
 0x1f4   :  { %2171 = vmatpush.bf16.msrb.mxu3 %v3662_v23  ;;  %v4056_v23 = vld [vmem:[#allocation5 + $0x3ac] sm:$0xf]  ;;  %v3602_v33 = vor.u32 %v4048_v30, %v3599_v32  ;;  %2503 = vmatpush.bf16.msrb.mxu0 %v4074_v44 }
 0x1f5   :  { %2201 = vmatpush.bf16.msra.mxu1 %v3346_v25  ;;  %2166 = vmatmul.bf16.vlgmr.msrb.gmra.mxu2 %v4408_v5  ;;  %v3631_v25 = vld [vmem:[#allocation5 + $0x3b8] sm:$0xf0] }
 0x1f6   :  { %2210 = vmatpush.bf16.msra.mxu2 %v3538_v26  ;;  %v3634_v26 = vor.u32 %v4056_v23, %v3631_v25 }
 0x1f8   :  { %2172 = vmatpush.bf16.msrb.mxu3 %v3646_v36  ;;  %v3586_v36 = vor.u32 %v4044_v34, %v3583_v35  ;;  %v4096_v35 = vld [vmem:[%s4556_s7 + $0xe8] sm:$0xff] }
 0x1f9   :  { %2202 = vmatpush.bf16.msra.mxu1 %v3330_v37  ;;  %v4040_v37 = vld [vmem:[#allocation5 + $0x32c] sm:$0xf] }
 0x1fa   :  { %2211 = vmatpush.bf16.msra.mxu2 %v3522_v38  ;;  %v3567_v38 = vld [vmem:[#allocation5 + $0x338] sm:$0xf0] }
 0x1fb   :  { %v3570_v39 = vor.u32 %v4040_v37, %v3567_v38 }
 0x1fc   :  { %2173 = vmatpush.bf16.msrb.mxu3 %v3630_v45  ;;  %v4073_v45 = vld [vmem:[%s4556_s7 + $0x30] sm:$0xff] }
 0x1fd   :  { %2203 = vmatpush.bf16.msra.mxu1 %v3314_v31  ;;  %2504 = vmatpush.bf16.msrb.mxu0 %v4073_v45 }
 0x1fe   :  { %2212 = vmatpush.bf16.msra.mxu2 %v3506_v48 }
 0x200   :  { %2174 = vmatpush.bf16.msrb.mxu3 %v3614_v54  ;;  %v4081_v54 = vld [vmem:[%s4556_s7 + $0x70] sm:$0xff] }
 0x201   :  { %2204 = vmatpush.bf16.msra.mxu1 %v3298_v55  ;;  %2505 = vmatpush.bf16.msrb.mxu0 %v4072_v49 }
 0x202   :  { %2213 = vmatpush.bf16.msra.mxu2 %v3490_v56 }
 0x203   :  { %2127 = vmatmul.bf16.vlgmr.msra.gmra.mxu3 %v4416_v24 }
 0x204   :  { %2175 = vmatpush.bf16.msrb.mxu3 %v3598_v61  ;;  %2205 = vmatmul.bf16.vlgmr.msra.gmra.mxu1 %v4403_v46  ;;  %v3426_v46 = vor.u32 %v4004_v12, %v3423_v13  ;;  %v4086_v13 = vld [vmem:[%s4556_s7 + $0x98] sm:$0xff] }
 0x205   :  { %2516 = vmatpush.bf16.msrb.mxu1 %v4082_v52 }
 0x206   :  { %2214 = vmatpush.bf16.msra.mxu2 %v3474_v62 }
 0x208   :  { %2176 = vmatpush.bf16.msrb.mxu3 %v3582_v2  ;;  %v4089_v2 = vld [vmem:[%s4556_s7 + $0xb0] sm:$0xff] }
 0x209   :  { %2517 = vmatpush.bf16.msrb.mxu1 %v4081_v54 }
 0x20a   :  { %2215 = vmatpush.bf16.msra.mxu2 %v3458_v3 }
 0x20c   :  { %2177 = vmatpush.bf16.msrb.mxu3 %v3566_v9  ;;  %v4087_v9 = vld [vmem:[%s4556_s7 + $0xa0] sm:$0xff] }
 0x20d   :  { %2518 = vmatpush.bf16.msrb.mxu1 %v4080_v58 }
 0x20e   :  { %2216 = vmatpush.bf16.msra.mxu2 %v3442_v10  ;;  %v4497_v10 = vld [vmem:[%s4555_s6] sm:$0xf] }
 0x20f   :  { %v1380_v12 = vperm.slane %v4497_v10, 0  ;;  %v1381_v32 = vperm.slane %v4497_v10, 1  ;;  %v1382_v49 = vperm.slane %v4497_v10, 2 }
 0x210   :  { %2178 = vmatpush.bf16.msrb.mxu3 %v3550_v17 }
 0x211   :  { %2519 = vmatpush.bf16.msrb.mxu1 %v4079_v60 }
 0x212   :  { %2217 = vmatpush.bf16.msra.mxu2 %v3426_v46 }
 0x213   :  { %2179 = vmatmul.bf16.vlgmr.msrb.gmra.mxu3 %v4416_v24 }
 0x214   :  { %2223 = vmatpush.bf16.msra.mxu3 %v3666_v18 }
 0x215   :  { %2218 = vmatmul.bf16.vlgmr.msra.gmra.mxu2 %v4408_v5  ;;  %v3551_v5 = vld [vmem:[#allocation5 + $0x318] sm:$0xf0]  ;;  %2520 = vmatpush.bf16.msrb.mxu1 %v4078_v16 }
 0x216   :  { %v3554_v41 = vor.u32 %v4036_v40, %v3551_v5  ;;  %2529 = vmatpush.bf16.msrb.mxu2 %v4090_v21  ;;  %v4095_v40 = vld [vmem:[%s4556_s7 + $0xe0] sm:$0xff] }
 0x218   :  { %2224 = vmatpush.bf16.msra.mxu3 %v3650_v22 }
 0x219   :  { %2521 = vmatpush.bf16.msrb.mxu1 %v4077_v1 }
 0x21a   :  { %2530 = vmatpush.bf16.msrb.mxu2 %v4089_v2 }
 0x21c   :  { %2225 = vmatpush.bf16.msra.mxu3 %v3634_v26 }
 0x21d   :  { %2522 = vmatpush.bf16.msrb.mxu1 %v4076_v6 }
 0x21e   :  { %2531 = vmatpush.bf16.msrb.mxu2 %v4088_v7 }
 0x220   :  { %2226 = vmatpush.bf16.msra.mxu3 %v3618_v29 }
 0x221   :  { %2523 = vmatpush.bf16.msrb.mxu1 %v4075_v8 }
 0x222   :  { %2532 = vmatpush.bf16.msrb.mxu2 %v4087_v9 }
 0x224   :  { %2227 = vmatpush.bf16.msra.mxu3 %v3602_v33  ;;  %v4097_v33 = vld [vmem:[%s4556_s7 + $0xf0] sm:$0xff] }
 0x226   :  { %2533 = vmatpush.bf16.msrb.mxu2 %v4086_v13 }
 0x228   :  { %2228 = vmatpush.bf16.msra.mxu3 %v3586_v36 }
 0x22a   :  { %2534 = vmatpush.bf16.msrb.mxu2 %v4085_v14 }
 0x22c   :  { %2229 = vmatpush.bf16.msra.mxu3 %v3570_v39 }
 0x22e   :  { %2535 = vmatpush.bf16.msrb.mxu2 %v4084_v20 }
 0x230   :  { %2230 = vmatpush.bf16.msra.mxu3 %v3554_v41  ;;  %v2037_v0 = vpop.f32.mrf.mxu0 }
 0x231   :  { %v2038_v17 = vadd.f32 %v2037_v0, %v1380_v12  ;;  %v4104_v12 = vld [vmem:[%s4557_s8] ss:$0 sm:$0xff] }
 0x232   :  { %2536 = vmatpush.bf16.msrb.mxu2 %v4083_v27 }
 0x233   :  { %2231 = vmatmul.bf16.vlgmr.msra.gmra.mxu3 %v4416_v24  ;;  %v4071_v24 = vld [vmem:[%s4556_s7 + $0x20] sm:$0xff] }
 0x234   :  { %2506 = vmatpush.bf16.msrb.mxu0 %v4071_v24  ;;  %2542 = vmatpush.bf16.msrb.mxu3 %v4098_v28 }
 0x238   :  { %v2039_v42 = vpop.f32.mrf.mxu0  ;;  %2507 = vmatpush.bf16.msrb.mxu0 %v4070_v43  ;;  %2543 = vmatpush.bf16.msrb.mxu3 %v4097_v33 }
 0x239   :  { %v4094_v42 = vld [vmem:[%s4556_s7 + $0xd8] sm:$0xff] }
 0x23c   :  { %2508 = vmatpush.bf16.msrb.mxu0 %v4069_v53  ;;  %2544 = vmatpush.bf16.msrb.mxu3 %v4096_v35  ;;  %v4091_v53 = vld [vmem:[%s4556_s7 + $0xc0] sm:$0xff] }
 0x240   :  { %v2050_v31 = vpop.f32.mrf.mxu1  ;;  %v4432_v48 = vpop.f32.mrf.mxu0  ;;  %2509 = vmatpush.bf16.msrb.mxu0 %v4068_v57  ;;  %2545 = vmatpush.bf16.msrb.mxu3 %v4095_v40 }
 0x241   :  { %v2051_v18 = vadd.f32 %v2050_v31, %v2038_v17  ;;  %v2090_v36 = vadd.f32 %v4432_v48, %v1381_v32  ;;  %v4093_v48 = vld [vmem:[%s4556_s7 + $0xd0] sm:$0xff] }
 0x244   :  { %2510 = vmatpush.bf16.msrb.mxu0 %v4067_v59  ;;  %2546 = vmatpush.bf16.msrb.mxu3 %v4094_v42 }
 0x248   :  { %v2052_v50 = vpop.f32.mrf.mxu1  ;;  %v2091_v51 = vpop.f32.mrf.mxu0  ;;  %2547 = vmatpush.bf16.msrb.mxu3 %v4093_v48 }
 0x249   :  { %v4092_v51 = vld [vmem:[%s4556_s7 + $0xc8] sm:$0xff] }
 0x24c   :  { %2548 = vmatpush.bf16.msrb.mxu3 %v4092_v51 }
 0x250   :  { %v4452_v55 = vpop.f32.mrf.mxu1  ;;  %v4454_v56 = vpop.f32.mrf.mxu0  ;;  %2549 = vmatpush.bf16.msrb.mxu3 %v4091_v53 }
 0x251   :  { %v2103_v39 = vadd.f32 %v4452_v55, %v2090_v36  ;;  %v2142_v50 = vadd.f32 %v4454_v56, %v1382_v49 }
 0x257   :  { %v2063_v61 = vpop.f32.mrf.mxu2 }
 0x258   :  { %v2104_v62 = vpop.f32.mrf.mxu1  ;;  %v2143_v63 = vpop.f32.mrf.mxu0  ;;  %v2064_v19 = vadd.f32 %v2063_v61, %v2051_v18  ;;  %v1383_v61 = vperm.slane %v4497_v10, 3 }
 0x25f   :  { %v2065_v3 = vpop.f32.mrf.mxu2 }
 0x261   :  { %v4480_v4 = vpop.f32.mrf.mxu1 }
 0x262   :  { %v2155_v43 = vadd.f32 %v4480_v4, %v2142_v50 }
 0x268   :  { %v2115_v11 = vpop.f32.mrf.mxu2 }
 0x269   :  { %v2156_v47 = vpop.f32.mrf.mxu1  ;;  %v2116_v5 = vadd.f32 %v2115_v11, %v2103_v39 }
 0x270   :  { %v2193_v15 = vpop.f32.mrf.mxu0  ;;  %v2117_v46 = vpop.f32.mrf.mxu2 }
 0x271   :  { %v2194_v62 = vadd.f32 %v2193_v15, %v1383_v61 }
 0x276   :  { %v2076_v22 = vpop.f32.mrf.mxu3 }
 0x277   :  { %v2077_v23 = vadd.f32 %v2076_v22, %v2064_v19 }
 0x278   :  { %v2195_v25 = vpop.f32.mrf.mxu0  ;;  %v2167_v29 = vpop.f32.mrf.mxu2 }
 0x279   :  { %v2236_v26 = vmax.f32 %v2077_v23, 0.0  ;;  %v2168_v52 = vadd.f32 %v2167_v29, %v2155_v43 }
 0x27b   :  { %v2240_v30 = vpack.c.bf16 %v2236_v26, %v2236_v26 }
 0x27d   :  { %2511 = vmatmul.bf16.vlgmr.msrb.gmra.mxu0 %v2240_v30 }
 0x27e   :  { %v2078_v34 = vpop.f32.mrf.mxu3 }
 0x280   :  { %v2169_v38 = vpop.f32.mrf.mxu2 }
 0x281   :  { %v2206_v37 = vpop.f32.mrf.mxu1 }
 0x282   :  { %v2207_v63 = vadd.f32 %v2206_v37, %v2194_v62 }
 0x286   :  { %v2128_v41 = vpop.f32.mrf.mxu3 }
 0x287   :  { %v2129_v0 = vadd.f32 %v2128_v41, %v2116_v5 }
 0x289   :  { %v2237_v44 = vmax.f32 %v2129_v0, 0.0  ;;  %v2208_v45 = vpop.f32.mrf.mxu1 }
 0x28b   :  { %v2241_v31 = vpack.c.bf16 %v2237_v44, %v2237_v44 }
 0x28d   :  { %2524 = vmatmul.bf16.vlgmr.msrb.gmra.mxu1 %v2241_v31 }
 0x28e   :  { %v2130_v24 = vpop.f32.mrf.mxu3 }
 0x296   :  { %v2180_v54 = vpop.f32.mrf.mxu3 }
 0x297   :  { %v2181_v55 = vadd.f32 %v2180_v54, %v2168_v52 }
 0x298   :  { %v2219_v57 = vpop.f32.mrf.mxu2 }
 0x299   :  { %v2238_v58 = vmax.f32 %v2181_v55, 0.0  ;;  %v2220_v16 = vadd.f32 %v2219_v57, %v2207_v63 }
 0x29b   :  { %v2242_v59 = vpack.c.bf16 %v2238_v58, %v2238_v58 }
 0x29d   :  { %2537 = vmatmul.bf16.vlgmr.msrb.gmra.mxu2 %v2242_v59 }
 0x29e   :  { %v2182_v56 = vpop.f32.mrf.mxu3 }
 0x2a0   :  { %v2221_v60 = vpop.f32.mrf.mxu2 }
 0x2b6   :  { %v2232_v21 = vpop.f32.mrf.mxu3 }
 0x2b7   :  { %v2233_v1 = vadd.f32 %v2232_v21, %v2220_v16 }
 0x2b9   :  { %v2239_v2 = vmax.f32 %v2233_v1, 0.0 }
 0x2bb   :  { %v2243_v3 = vpack.c.bf16 %v2239_v2, %v2239_v2 }
 0x2bd   :  { %2550 = vmatmul.bf16.vlgmr.msrb.gmra.mxu3 %v2243_v3 }
 0x2be   :  { %v2234_v4 = vpop.f32.mrf.mxu3 }
 0x2fa   :  { %v2512_v6 = vpop.f32.mrf.mxu0 }
 0x2fb   :  { %v2513_v10 = vadd.f32 %v4104_v12, %v2512_v6 }
 0x302   :  { %v2514_v7 = vpop.f32.mrf.mxu0 }
 0x30a   :  { %v2525_v8 = vpop.f32.mrf.mxu1 }
 0x30b   :  { %v2526_v13 = vadd.f32 %v2525_v8, %v2513_v10 }
 0x312   :  { %v2527_v9 = vpop.f32.mrf.mxu1 }
 0x320   :  { %v2538_v11 = vpop.f32.mrf.mxu2 }
 0x321   :  { %v2539_v14 = vadd.f32 %v2538_v11, %v2526_v13 }
 0x328   :  { %v2540_v47 = vpop.f32.mrf.mxu2 }
 0x340   :  { %v2551_v15 = vpop.f32.mrf.mxu3 }
 0x341   :  { %v2552_v17 = vadd.f32 %v2551_v15, %v2539_v14 }
 0x343   :  { %2556 = vst.msk [vmem:[#allocation7] sm:$0x3] %vm2555_vm5, %v2552_v17 }
 0x344   :  { %2567 = dma.vmem_to_hbm [thread:$0]  %s2563_s0, 32, %s2565_s29, [#allocation4]  }
 0x348   :  { %v2553_v46 = vpop.f32.mrf.mxu3 }
 0x349   :  { %4183 = dma.done.wait [#allocation4], 32  }
 0x34a   :  { %4184 = vsyncadd [#allocation4], 4294967264 }
 0x34b   :  { %2572 = vsyncpa [#allocation3], 1 }
 0x34c   :  { %2573 = vsyncpa [#allocation6], 1 }
 0x34d   :  { %2574 = vsyncpa [#allocation4], 1 }

</bundles_post_ra>
